<compile_context>
chip_gen: v6e
topology: v6e:2x2x1
jax: 0.10.0
libtpu: 0.0.40
codegen_flags: <defaults>
</compile_context>

<pallas_src>
import functools

import jax
import jax.numpy as jnp
from jax.experimental import pallas as pl
from jax.experimental.pallas import tpu as pltpu


def _round_up(x, m):
    return (x + m - 1) // m * m


_TK_MAX = 4096   # K tile cap for FC matmuls (4096x128 bf16 weight tile = 1 MB)
_TM_MAX = 512    # M tile cap


def _choose_tk(k):
    return min(_TK_MAX, _round_up(k, 128))


# ---------------------------------------------------------------------------
# Kernel 1: tiled matmul + bias + optional ReLU (MXU) for the FC layers.
# Grid = (M tiles, K tiles); K is the reduction ("arbitrary") axis with an f32
# VMEM accumulator (zeroed at k==0, bias+ReLU+store at the last k step).
# MXU inputs are bf16; accumulation / epilogue are f32.
# ---------------------------------------------------------------------------
def _linear_kernel(x_ref, w_ref, b_ref, o_ref, acc_ref, *, apply_relu):
    @pl.when(pl.program_id(1) == 0)
    def _():
        acc_ref[...] = jnp.zeros_like(acc_ref)

    acc_ref[...] += jnp.dot(x_ref[...], w_ref[...],
                            preferred_element_type=jnp.float32)

    @pl.when(pl.program_id(1) == pl.num_programs(1) - 1)
    def _():
        r = acc_ref[...] + b_ref[...]
        if apply_relu:
            r = jnp.maximum(r, 0.0)
        o_ref[...] = r.astype(o_ref.dtype)


def linear_pallas(x, w_kn, b_1n, *, apply_relu, out_dtype):
    """y = relu?(x @ w + b).

    x:    (M, K) float (cast to bf16 here).
    w_kn: (Kp, N) bf16, pre-transposed to (K, N) and K-padded to a multiple of
          the K tile by prepare_params() (done once, outside the forward path).
    b_1n: (1, N) f32.
    """
    m, k = x.shape
    kp, n = w_kn.shape
    tk = min(_TK_MAX, kp)
    assert kp % tk == 0, (kp, tk)
    tm = min(_TM_MAX, _round_up(m, 8))
    mp = _round_up(m, tm)
    xp = jnp.pad(x.astype(jnp.bfloat16), ((0, mp - m), (0, kp - k)))

    cost = pl.CostEstimate(
        flops=int(2 * m * k * n),
        transcendentals=0,
        bytes_accessed=int(mp * kp * 2 + kp * n * 2 + mp * n * 4 + n * 4))

    out = pl.pallas_call(
        functools.partial(_linear_kernel, apply_relu=apply_relu),
        out_shape=jax.ShapeDtypeStruct((mp, n), out_dtype),
        grid_spec=pltpu.PrefetchScalarGridSpec(
            num_scalar_prefetch=0,
            grid=(mp // tm, kp // tk),
            in_specs=[
                pl.BlockSpec((tm, tk), lambda i, j: (i, j)),
                pl.BlockSpec((tk, n), lambda i, j: (j, 0)),
                # Constant block index -> bias tile is DMA'd once, not per K step.
                pl.BlockSpec((1, n), lambda i, j: (0, 0)),
            ],
            out_specs=pl.BlockSpec((tm, n), lambda i, j: (i, 0)),
            scratch_shapes=[pltpu.VMEM((tm, n), jnp.float32)],
        ),
        compiler_params=pltpu.CompilerParams(
            dimension_semantics=("parallel", "arbitrary")),
        cost_estimate=cost,
    )(xp, w_kn, b_1n)
    # TODO(synk): on v7x, split the K reduction across the two TensorCores
    # (2-way parallel grid axis + partial-sum epilogue) since M here is tiny.
    return out[:m]


# ---------------------------------------------------------------------------
# Kernel 2: fused Conv2d(3x3, VALID) + bias + ReLU + MaxPool2d(2, 2), NHWC.
# Grid over batch.  The kernel loops over pooled output rows; for each it
# builds the (Wo, 9*Cin) im2col patch for the two contributing conv rows from
# contiguous VMEM reads (in-VMEM im2col -> no HBM blow-up), runs one bf16 MXU
# matmul per conv row, takes the 2x2 max (rows via elementwise max, columns via
# a constant 0/1 selection matmul on the neighbour-max), then applies bias+ReLU
# and writes only the pooled row.  relu(x+b) and max commute (both monotone),
# so pooling first is exact.
# ---------------------------------------------------------------------------
def _conv3x3_relu_pool_kernel(x_ref, w_ref, b_ref, o_ref):
    hp, wp, cout = o_ref.shape[1], o_ref.shape[2], o_ref.shape[3]
    wo = x_ref.shape[2] - 2                  # conv output width (VALID 3x3)
    w_full = w_ref[...]                      # (9*Cin, Cout) bf16, (dy,dx,cin) rows
    bias = b_ref[...]                        # (1, Cout) f32

    # Constant 0/1 matrix selecting columns 0,2,4,... of the neighbour-max row:
    # pooled = sel @ nm, where nm[i] = max(conv[i], conv[i+1]).
    rows2 = jax.lax.broadcasted_iota(jnp.int32, (wp, wo - 1), 0)
    cols2 = jax.lax.broadcasted_iota(jnp.int32, (wp, wo - 1), 1)
    sel = (cols2 == 2 * rows2).astype(jnp.bfloat16)

    def conv_row(c):
        # im2col of one conv output row, built from contiguous VMEM reads only.
        pieces = [x_ref[0, c + dy, pl.ds(dx, wo), :]
                  for dy in range(3) for dx in range(3)]
        patch = jnp.concatenate(pieces, axis=-1).astype(jnp.bfloat16)  # (Wo, 9*Cin)
        return jnp.dot(patch, w_full, preferred_element_type=jnp.float32)

    def row_body(r, carry):
        rowmax = jnp.maximum(conv_row(2 * r), conv_row(2 * r + 1))    # (Wo, Cout)
        nm = jnp.maximum(rowmax[:-1, :], rowmax[1:, :])               # (Wo-1, Cout)
        pooled = jnp.dot(sel, nm.astype(jnp.bfloat16),
                         preferred_element_type=jnp.float32)          # (Wp, Cout)
        y = jnp.maximum(pooled + bias, 0.0)                           # bias + ReLU
        o_ref[0, pl.ds(r, 1), :, :] = y.reshape(1, wp, cout).astype(o_ref.dtype)
        return carry

    jax.lax.fori_loop(0, hp, row_body, 0)


def conv3x3_relu_pool_pallas(x, w_mat, b_1c):
    """x: (N, H, W, Cin) NHWC; w_mat: (9*Cin, Cout) bf16; b_1c: (1, Cout) f32."""
    n, h, w, cin = x.shape
    cout = w_mat.shape[1]
    ho, wo = h - 2, w - 2
    hp, wp = ho // 2, wo // 2                # MaxPool2d(2,2) floor semantics

    cost = pl.CostEstimate(
        flops=int(2 * n * (2 * hp) * (2 * wp) * 9 * cin * cout),
        transcendentals=0,
        bytes_accessed=int(x.size * x.dtype.itemsize + w_mat.size * 2
                           + n * hp * wp * cout * 4 + cout * 4))

    # TODO(synk): for very large spatial inputs (e.g. the original ~582x410),
    # tile the grid over row strips with a 2-row halo fetched via manual
    # pltpu.make_async_copy so the whole (lane-padded) image never sits in VMEM.
    return pl.pallas_call(
        _conv3x3_relu_pool_kernel,
        out_shape=jax.ShapeDtypeStruct((n, hp, wp, cout), jnp.float32),
        grid=(n,),
        in_specs=[
            pl.BlockSpec((1, h, w, cin), lambda i: (i, 0, 0, 0)),
            pl.BlockSpec((9 * cin, cout), lambda i: (0, 0)),
            pl.BlockSpec((1, cout), lambda i: (0, 0)),
        ],
        out_specs=pl.BlockSpec((1, hp, wp, cout), lambda i: (i, 0, 0, 0)),
        compiler_params=pltpu.CompilerParams(
            dimension_semantics=("parallel",)),
        cost_estimate=cost,
    )(x, w_mat, b_1c)


# ---------------------------------------------------------------------------
# One-time parameter preparation (outside the per-forward path).
# ---------------------------------------------------------------------------
def prepare_params(p):
    """Conv weights -> (9*Cin, Cout) bf16 in (dy, dx, cin) row order; FC weights
    transposed to (K, N), K-padded to the K tile and cast to bf16; biases to
    (1, N) f32."""
    def conv_w(w_oihw):
        cout, cin, kh, kw = w_oihw.shape
        return (jnp.transpose(w_oihw, (2, 3, 1, 0))      # (kh, kw, Cin, Cout)
                .reshape(kh * kw * cin, cout).astype(jnp.bfloat16))

    def fc_w(w_out_in):
        wt = jnp.transpose(w_out_in, (1, 0))             # (K, N)
        k = wt.shape[0]
        kp = _round_up(k, _choose_tk(k))
        return jnp.pad(wt, ((0, kp - k), (0, 0))).astype(jnp.bfloat16)

    def bias(b):
        return b.reshape(1, -1).astype(jnp.float32)

    return {
        "conv1_w": conv_w(p["conv1_w"]), "conv1_b": bias(p["conv1_b"]),
        "conv2_w": conv_w(p["conv2_w"]), "conv2_b": bias(p["conv2_b"]),
        "fc1_w": fc_w(p["fc1_w"]), "fc1_b": bias(p["fc1_b"]),
        "fc2_w": fc_w(p["fc2_w"]), "fc2_b": bias(p["fc2_b"]),
        "fc3_w": fc_w(p["fc3_w"]), "fc3_b": bias(p["fc3_b"]),
    }


# ---------------------------------------------------------------------------
# Full forward pass (inference) with prepared params.
# ---------------------------------------------------------------------------
def neuralnet_forward(x_nchw, q):
    x = jnp.transpose(x_nchw, (0, 2, 3, 1))              # NCHW -> NHWC
    x = conv3x3_relu_pool_pallas(x, q["conv1_w"], q["conv1_b"])
    x = conv3x3_relu_pool_pallas(x, q["conv2_w"], q["conv2_b"])
    # TODO(synk): Dropout(p=0.25) layers are identity at inference; train-mode
    # dropout would use pltpu.prng_seed / pltpu.prng_random_bits in-kernel.
    n = x.shape[0]
    x = jnp.transpose(x, (0, 3, 1, 2)).reshape(n, -1)    # torch.flatten (NCHW order)
    x = linear_pallas(x, q["fc1_w"], q["fc1_b"], apply_relu=True,
                      out_dtype=jnp.bfloat16)
    x = linear_pallas(x, q["fc2_w"], q["fc2_b"], apply_relu=True,
                      out_dtype=jnp.bfloat16)
    x = linear_pallas(x, q["fc3_w"], q["fc3_b"], apply_relu=False,
                      out_dtype=jnp.float32)
    return x


def init_params(key, in_hw):
    """Deterministic parameter init with PyTorch-layout shapes."""
    H, W = in_hw
    Hp1, Wp1 = (H - 2) // 2, (W - 2) // 2
    Hp2, Wp2 = (Hp1 - 2) // 2, (Wp1 - 2) // 2
    fc1_in = 32 * Hp2 * Wp2   # == 32*144*101 for the original ~(3, 582, 410) input
    ks = jax.random.split(key, 10)

    def w(k, shape, fan_in):
        return jax.random.normal(k, shape, jnp.float32) / jnp.sqrt(float(fan_in))

    return {
        "conv1_w": w(ks[0], (16, 3, 3, 3), 27),
        "conv1_b": w(ks[1], (16,), 27),
        "conv2_w": w(ks[2], (32, 16, 3, 3), 144),
        "conv2_b": w(ks[3], (32,), 144),
        "fc1_w": w(ks[4], (128, fc1_in), fc1_in),
        "fc1_b": w(ks[5], (128,), fc1_in),
        "fc2_w": w(ks[6], (64, 128), 128),
        "fc2_b": w(ks[7], (64,), 128),
        "fc3_w": w(ks[8], (54, 64), 64),
        "fc3_b": w(ks[9], (54,), 64),
    }


# Pure-JAX f32 reference (no Pallas) for correctness checking.
def reference_forward(x_nchw, p):
    dn = ("NCHW", "OIHW", "NCHW")
    y = jax.lax.conv_general_dilated(x_nchw, p["conv1_w"], (1, 1), "VALID",
                                     dimension_numbers=dn)
    y = jax.nn.relu(y + p["conv1_b"][None, :, None, None])
    y = jax.lax.reduce_window(y, -jnp.inf, jax.lax.max,
                              (1, 1, 2, 2), (1, 1, 2, 2), "VALID")
    y = jax.lax.conv_general_dilated(y, p["conv2_w"], (1, 1), "VALID",
                                     dimension_numbers=dn)
    y = jax.nn.relu(y + p["conv2_b"][None, :, None, None])
    y = jax.lax.reduce_window(y, -jnp.inf, jax.lax.max,
                              (1, 1, 2, 2), (1, 1, 2, 2), "VALID")
    y = y.reshape(y.shape[0], -1)
    y = jax.nn.relu(y @ p["fc1_w"].T + p["fc1_b"])
    y = jax.nn.relu(y @ p["fc2_w"].T + p["fc2_b"])
    return y @ p["fc3_w"].T + p["fc3_b"]


if __name__ == "__main__":
    # Small demo shape (the original module implies ~(N, 3, 582, 410)).
    N, H, W = 2, 30, 30
    x = jax.random.normal(jax.random.PRNGKey(0), (N, 3, H, W), jnp.float32)
    params = init_params(jax.random.PRNGKey(42), (H, W))
    prep = prepare_params(params)      # one-time: transpose / pad / cast weights

    fwd = jax.jit(neuralnet_forward)
    out = jax.block_until_ready(fwd(x, prep))
    assert out.shape == (N, 54), out.shape

    ref = reference_forward(x, params)
    max_err = float(jnp.max(jnp.abs(out - ref)))
    # bf16 MXU operands vs a pure-f32 reference -> loosened tolerance.
    assert jnp.allclose(out, ref, rtol=5e-2, atol=5e-2), f"max_err={max_err}"

    print("KERNEL_OK")
</pallas_src>

<mosaic_0001>
module attributes {stable_mosaic.version = 11 : i64} {
  func.func @_conv3x3_relu_pool_kernel(%arg0: i32, %arg1: memref<1x30x30x3xf32, #tpu.memory_space<vmem>>, %arg2: memref<27x16xbf16, #tpu.memory_space<vmem>>, %arg3: memref<1x16xf32, #tpu.memory_space<vmem>>, %arg4: memref<1x14x14x16xf32, #tpu.memory_space<vmem>>) attributes {dimension_semantics = [#tpu.dimension_semantics<parallel>], iteration_bounds = array<i64: 2>, scalar_prefetch = 0 : i64, scratch_operands = 0 : i64, tpu.core_type = #tpu.core_type<tc>, window_params = [{transform_indices = @transform_0, window_bounds = array<i64: 1, 30, 30, 3>}, {pipeline_mode = #tpu.pipeline_mode<synchronous>, transform_indices = @transform_1, window_bounds = array<i64: 27, 16>}, {pipeline_mode = #tpu.pipeline_mode<synchronous>, transform_indices = @transform_2, window_bounds = array<i64: 1, 16>}, {transform_indices = @transform_3, window_bounds = array<i64: 1, 14, 14, 16>}]} {
    %c0 = arith.constant 0 : index
    %c0_0 = arith.constant 0 : index
    %0 = vector.load %arg2[%c0, %c0_0] : memref<27x16xbf16, #tpu.memory_space<vmem>>, vector<27x16xbf16>
    %c0_1 = arith.constant 0 : index
    %c0_2 = arith.constant 0 : index
    %1 = vector.load %arg3[%c0_1, %c0_2] : memref<1x16xf32, #tpu.memory_space<vmem>>, vector<1x16xf32>
    %2 = tpu.iota {dimensions = array<i32: 0>} : vector<14x27xi32>
    %3 = tpu.iota {dimensions = array<i32: 1>} : vector<14x27xi32>
    %c2_i32 = arith.constant 2 : i32
    %4 = vector.broadcast %c2_i32 : i32 to vector<14x27xi32>
    %5 = arith.muli %4, %2 : vector<14x27xi32>
    %6 = arith.cmpi eq, %3, %5 : vector<14x27xi32>
    %7 = arith.extui %6 : vector<14x27xi1> to vector<14x27xi32>
    %8 = arith.sitofp %7 : vector<14x27xi32> to vector<14x27xf32>
    %9 = arith.truncf %8 : vector<14x27xf32> to vector<14x27xbf16>
    %c0_i32 = arith.constant 0 : i32
    %c14_i32 = arith.constant 14 : i32
    %10 = arith.addi %c0_i32, %c14_i32 : i32
    %c1_i32 = arith.constant 1 : i32
    scf.for %arg5 = %c0_i32 to %10 step %c1_i32  : i32 {
      %c2_i32_4 = arith.constant 2 : i32
      %11 = arith.muli %c2_i32_4, %arg5 : i32
      %c0_i32_5 = arith.constant 0 : i32
      %12 = arith.addi %11, %c0_i32_5 : i32
      %c0_6 = arith.constant 0 : index
      %13 = arith.index_cast %12 : i32 to index
      %c0_7 = arith.constant 0 : index
      %c0_8 = arith.constant 0 : index
      %14 = vector.load %arg1[%c0_6, %13, %c0_7, %c0_8] : memref<1x30x30x3xf32, #tpu.memory_space<vmem>>, vector<1x1x28x3xf32>
      %15 = vector.shape_cast %14 : vector<1x1x28x3xf32> to vector<28x3xf32>
      %c0_i32_9 = arith.constant 0 : i32
      %16 = arith.addi %11, %c0_i32_9 : i32
      %c0_10 = arith.constant 0 : index
      %17 = arith.index_cast %16 : i32 to index
      %c1 = arith.constant 1 : index
      %c0_11 = arith.constant 0 : index
      %18 = vector.load %arg1[%c0_10, %17, %c1, %c0_11] : memref<1x30x30x3xf32, #tpu.memory_space<vmem>>, vector<1x1x28x3xf32>
      %19 = vector.shape_cast %18 : vector<1x1x28x3xf32> to vector<28x3xf32>
      %c0_i32_12 = arith.constant 0 : i32
      %20 = arith.addi %11, %c0_i32_12 : i32
      %c0_13 = arith.constant 0 : index
      %21 = arith.index_cast %20 : i32 to index
      %c2 = arith.constant 2 : index
      %c0_14 = arith.constant 0 : index
      %22 = vector.load %arg1[%c0_13, %21, %c2, %c0_14] : memref<1x30x30x3xf32, #tpu.memory_space<vmem>>, vector<1x1x28x3xf32>
      %23 = vector.shape_cast %22 : vector<1x1x28x3xf32> to vector<28x3xf32>
      %c1_i32_15 = arith.constant 1 : i32
      %24 = arith.addi %11, %c1_i32_15 : i32
      %c0_16 = arith.constant 0 : index
      %25 = arith.index_cast %24 : i32 to index
      %c0_17 = arith.constant 0 : index
      %c0_18 = arith.constant 0 : index
      %26 = vector.load %arg1[%c0_16, %25, %c0_17, %c0_18] : memref<1x30x30x3xf32, #tpu.memory_space<vmem>>, vector<1x1x28x3xf32>
      %27 = vector.shape_cast %26 : vector<1x1x28x3xf32> to vector<28x3xf32>
      %c1_i32_19 = arith.constant 1 : i32
      %28 = arith.addi %11, %c1_i32_19 : i32
      %c0_20 = arith.constant 0 : index
      %29 = arith.index_cast %28 : i32 to index
      %c1_21 = arith.constant 1 : index
      %c0_22 = arith.constant 0 : index
      %30 = vector.load %arg1[%c0_20, %29, %c1_21, %c0_22] : memref<1x30x30x3xf32, #tpu.memory_space<vmem>>, vector<1x1x28x3xf32>
      %31 = vector.shape_cast %30 : vector<1x1x28x3xf32> to vector<28x3xf32>
      %c1_i32_23 = arith.constant 1 : i32
      %32 = arith.addi %11, %c1_i32_23 : i32
      %c0_24 = arith.constant 0 : index
      %33 = arith.index_cast %32 : i32 to index
      %c2_25 = arith.constant 2 : index
      %c0_26 = arith.constant 0 : index
      %34 = vector.load %arg1[%c0_24, %33, %c2_25, %c0_26] : memref<1x30x30x3xf32, #tpu.memory_space<vmem>>, vector<1x1x28x3xf32>
      %35 = vector.shape_cast %34 : vector<1x1x28x3xf32> to vector<28x3xf32>
      %c2_i32_27 = arith.constant 2 : i32
      %36 = arith.addi %11, %c2_i32_27 : i32
      %c0_28 = arith.constant 0 : index
      %37 = arith.index_cast %36 : i32 to index
      %c0_29 = arith.constant 0 : index
      %c0_30 = arith.constant 0 : index
      %38 = vector.load %arg1[%c0_28, %37, %c0_29, %c0_30] : memref<1x30x30x3xf32, #tpu.memory_space<vmem>>, vector<1x1x28x3xf32>
      %39 = vector.shape_cast %38 : vector<1x1x28x3xf32> to vector<28x3xf32>
      %c2_i32_31 = arith.constant 2 : i32
      %40 = arith.addi %11, %c2_i32_31 : i32
      %c0_32 = arith.constant 0 : index
      %41 = arith.index_cast %40 : i32 to index
      %c1_33 = arith.constant 1 : index
      %c0_34 = arith.constant 0 : index
      %42 = vector.load %arg1[%c0_32, %41, %c1_33, %c0_34] : memref<1x30x30x3xf32, #tpu.memory_space<vmem>>, vector<1x1x28x3xf32>
      %43 = vector.shape_cast %42 : vector<1x1x28x3xf32> to vector<28x3xf32>
      %c2_i32_35 = arith.constant 2 : i32
      %44 = arith.addi %11, %c2_i32_35 : i32
      %c0_36 = arith.constant 0 : index
      %45 = arith.index_cast %44 : i32 to index
      %c2_37 = arith.constant 2 : index
      %c0_38 = arith.constant 0 : index
      %46 = vector.load %arg1[%c0_36, %45, %c2_37, %c0_38] : memref<1x30x30x3xf32, #tpu.memory_space<vmem>>, vector<1x1x28x3xf32>
      %47 = vector.shape_cast %46 : vector<1x1x28x3xf32> to vector<28x3xf32>
      %48 = tpu.concatenate %15, %19, %23, %27, %31, %35, %39, %43, %47 in 1 : vector<28x3xf32>, vector<28x3xf32>, vector<28x3xf32>, vector<28x3xf32>, vector<28x3xf32>, vector<28x3xf32>, vector<28x3xf32>, vector<28x3xf32>, vector<28x3xf32> -> vector<28x27xf32>
      %49 = arith.truncf %48 : vector<28x27xf32> to vector<28x27xbf16>
      %cst = arith.constant dense<0.000000e+00> : vector<28x16xf32>
      %50 = tpu.matmul %49, %0, %cst {dimension_numbers = #tpu.dot_dimension_numbers<[1], [0], [0], [1], [0, 0, 1, 1], [], []>} : vector<28x27xbf16>, vector<27x16xbf16>, vector<28x16xf32> -> vector<28x16xf32>
      %c2_i32_39 = arith.constant 2 : i32
      %51 = arith.muli %c2_i32_39, %arg5 : i32
      %c1_i32_40 = arith.constant 1 : i32
      %52 = arith.addi %51, %c1_i32_40 : i32
      %c0_i32_41 = arith.constant 0 : i32
      %53 = arith.addi %52, %c0_i32_41 : i32
      %c0_42 = arith.constant 0 : index
      %54 = arith.index_cast %53 : i32 to index
      %c0_43 = arith.constant 0 : index
      %c0_44 = arith.constant 0 : index
      %55 = vector.load %arg1[%c0_42, %54, %c0_43, %c0_44] : memref<1x30x30x3xf32, #tpu.memory_space<vmem>>, vector<1x1x28x3xf32>
      %56 = vector.shape_cast %55 : vector<1x1x28x3xf32> to vector<28x3xf32>
      %c0_i32_45 = arith.constant 0 : i32
      %57 = arith.addi %52, %c0_i32_45 : i32
      %c0_46 = arith.constant 0 : index
      %58 = arith.index_cast %57 : i32 to index
      %c1_47 = arith.constant 1 : index
      %c0_48 = arith.constant 0 : index
      %59 = vector.load %arg1[%c0_46, %58, %c1_47, %c0_48] : memref<1x30x30x3xf32, #tpu.memory_space<vmem>>, vector<1x1x28x3xf32>
      %60 = vector.shape_cast %59 : vector<1x1x28x3xf32> to vector<28x3xf32>
      %c0_i32_49 = arith.constant 0 : i32
      %61 = arith.addi %52, %c0_i32_49 : i32
      %c0_50 = arith.constant 0 : index
      %62 = arith.index_cast %61 : i32 to index
      %c2_51 = arith.constant 2 : index
      %c0_52 = arith.constant 0 : index
      %63 = vector.load %arg1[%c0_50, %62, %c2_51, %c0_52] : memref<1x30x30x3xf32, #tpu.memory_space<vmem>>, vector<1x1x28x3xf32>
      %64 = vector.shape_cast %63 : vector<1x1x28x3xf32> to vector<28x3xf32>
      %c1_i32_53 = arith.constant 1 : i32
      %65 = arith.addi %52, %c1_i32_53 : i32
      %c0_54 = arith.constant 0 : index
      %66 = arith.index_cast %65 : i32 to index
      %c0_55 = arith.constant 0 : index
      %c0_56 = arith.constant 0 : index
      %67 = vector.load %arg1[%c0_54, %66, %c0_55, %c0_56] : memref<1x30x30x3xf32, #tpu.memory_space<vmem>>, vector<1x1x28x3xf32>
      %68 = vector.shape_cast %67 : vector<1x1x28x3xf32> to vector<28x3xf32>
      %c1_i32_57 = arith.constant 1 : i32
      %69 = arith.addi %52, %c1_i32_57 : i32
      %c0_58 = arith.constant 0 : index
      %70 = arith.index_cast %69 : i32 to index
      %c1_59 = arith.constant 1 : index
      %c0_60 = arith.constant 0 : index
      %71 = vector.load %arg1[%c0_58, %70, %c1_59, %c0_60] : memref<1x30x30x3xf32, #tpu.memory_space<vmem>>, vector<1x1x28x3xf32>
      %72 = vector.shape_cast %71 : vector<1x1x28x3xf32> to vector<28x3xf32>
      %c1_i32_61 = arith.constant 1 : i32
      %73 = arith.addi %52, %c1_i32_61 : i32
      %c0_62 = arith.constant 0 : index
      %74 = arith.index_cast %73 : i32 to index
      %c2_63 = arith.constant 2 : index
      %c0_64 = arith.constant 0 : index
      %75 = vector.load %arg1[%c0_62, %74, %c2_63, %c0_64] : memref<1x30x30x3xf32, #tpu.memory_space<vmem>>, vector<1x1x28x3xf32>
      %76 = vector.shape_cast %75 : vector<1x1x28x3xf32> to vector<28x3xf32>
      %c2_i32_65 = arith.constant 2 : i32
      %77 = arith.addi %52, %c2_i32_65 : i32
      %c0_66 = arith.constant 0 : index
      %78 = arith.index_cast %77 : i32 to index
      %c0_67 = arith.constant 0 : index
      %c0_68 = arith.constant 0 : index
      %79 = vector.load %arg1[%c0_66, %78, %c0_67, %c0_68] : memref<1x30x30x3xf32, #tpu.memory_space<vmem>>, vector<1x1x28x3xf32>
      %80 = vector.shape_cast %79 : vector<1x1x28x3xf32> to vector<28x3xf32>
      %c2_i32_69 = arith.constant 2 : i32
      %81 = arith.addi %52, %c2_i32_69 : i32
      %c0_70 = arith.constant 0 : index
      %82 = arith.index_cast %81 : i32 to index
      %c1_71 = arith.constant 1 : index
      %c0_72 = arith.constant 0 : index
      %83 = vector.load %arg1[%c0_70, %82, %c1_71, %c0_72] : memref<1x30x30x3xf32, #tpu.memory_space<vmem>>, vector<1x1x28x3xf32>
      %84 = vector.shape_cast %83 : vector<1x1x28x3xf32> to vector<28x3xf32>
      %c2_i32_73 = arith.constant 2 : i32
      %85 = arith.addi %52, %c2_i32_73 : i32
      %c0_74 = arith.constant 0 : index
      %86 = arith.index_cast %85 : i32 to index
      %c2_75 = arith.constant 2 : index
      %c0_76 = arith.constant 0 : index
      %87 = vector.load %arg1[%c0_74, %86, %c2_75, %c0_76] : memref<1x30x30x3xf32, #tpu.memory_space<vmem>>, vector<1x1x28x3xf32>
      %88 = vector.shape_cast %87 : vector<1x1x28x3xf32> to vector<28x3xf32>
      %89 = tpu.concatenate %56, %60, %64, %68, %72, %76, %80, %84, %88 in 1 : vector<28x3xf32>, vector<28x3xf32>, vector<28x3xf32>, vector<28x3xf32>, vector<28x3xf32>, vector<28x3xf32>, vector<28x3xf32>, vector<28x3xf32>, vector<28x3xf32> -> vector<28x27xf32>
      %90 = arith.truncf %89 : vector<28x27xf32> to vector<28x27xbf16>
      %cst_77 = arith.constant dense<0.000000e+00> : vector<28x16xf32>
      %91 = tpu.matmul %90, %0, %cst_77 {dimension_numbers = #tpu.dot_dimension_numbers<[1], [0], [0], [1], [0, 0, 1, 1], [], []>} : vector<28x27xbf16>, vector<27x16xbf16>, vector<28x16xf32> -> vector<28x16xf32>
      %92 = arith.maximumf %50, %91 : vector<28x16xf32>
      %93 = vector.extract_strided_slice %92 {offsets = [0, 0], sizes = [27, 16], strides = [1, 1]} : vector<28x16xf32> to vector<27x16xf32>
      %94 = vector.extract_strided_slice %92 {offsets = [1, 0], sizes = [27, 16], strides = [1, 1]} : vector<28x16xf32> to vector<27x16xf32>
      %95 = arith.maximumf %93, %94 : vector<27x16xf32>
      %96 = arith.truncf %95 : vector<27x16xf32> to vector<27x16xbf16>
      %cst_78 = arith.constant dense<0.000000e+00> : vector<14x16xf32>
      %97 = tpu.matmul %9, %96, %cst_78 {dimension_numbers = #tpu.dot_dimension_numbers<[1], [0], [0], [1], [0, 0, 1, 1], [], []>} : vector<14x27xbf16>, vector<27x16xbf16>, vector<14x16xf32> -> vector<14x16xf32>
      %98 = vector.broadcast %1 : vector<1x16xf32> to vector<14x16xf32>
      %99 = arith.addf %97, %98 : vector<14x16xf32>
      %cst_79 = arith.constant 0.000000e+00 : f32
      %100 = vector.broadcast %cst_79 : f32 to vector<14x16xf32>
      %101 = arith.maximumf %99, %100 : vector<14x16xf32>
      %102 = vector.shape_cast %101 : vector<14x16xf32> to vector<1x14x16xf32>
      %c0_80 = arith.constant 0 : index
      %103 = arith.index_cast %arg5 : i32 to index
      %c0_81 = arith.constant 0 : index
      %c0_82 = arith.constant 0 : index
      %104 = vector.load %arg4[%c0_80, %103, %c0_81, %c0_82] : memref<1x14x14x16xf32, #tpu.memory_space<vmem>>, vector<1x1x14x16xf32>
      %105 = vector.shape_cast %104 : vector<1x1x14x16xf32> to vector<1x14x16xf32>
      %106 = vector.shape_cast %102 : vector<1x14x16xf32> to vector<1x1x14x16xf32>
      tpu.vector_store %arg4[%c0_80, %103, %c0_81, %c0_82], %106 {strides = array<i32>} : memref<1x14x14x16xf32, #tpu.memory_space<vmem>>, vector<1x1x14x16xf32>,
    }
    %c14_i32_3 = arith.constant 14 : i32
    return
  }
  func.func @transform_0(%arg0: i32) -> (i32, i32, i32, i32) {
    %c0_i32 = arith.constant 0 : i32
    %c0_i32_0 = arith.constant 0 : i32
    %c0_i32_1 = arith.constant 0 : i32
    %c0_i32_2 = arith.constant 0 : i32
    return %arg0, %c0_i32, %c0_i32_0, %c0_i32_1 : i32, i32, i32, i32
  }
  func.func @transform_1(%arg0: i32) -> (i32, i32) {
    %c0_i32 = arith.constant 0 : i32
    %c0_i32_0 = arith.constant 0 : i32
    %c0_i32_1 = arith.constant 0 : i32
    return %c0_i32, %c0_i32_0 : i32, i32
  }
  func.func @transform_2(%arg0: i32) -> (i32, i32) {
    %c0_i32 = arith.constant 0 : i32
    %c0_i32_0 = arith.constant 0 : i32
    %c0_i32_1 = arith.constant 0 : i32
    return %c0_i32, %c0_i32_0 : i32, i32
  }
  func.func @transform_3(%arg0: i32) -> (i32, i32, i32, i32) {
    %c0_i32 = arith.constant 0 : i32
    %c0_i32_0 = arith.constant 0 : i32
    %c0_i32_1 = arith.constant 0 : i32
    %c0_i32_2 = arith.constant 0 : i32
    return %arg0, %c0_i32, %c0_i32_0, %c0_i32_1 : i32, i32, i32, i32
  }
}

module attributes {stable_mosaic.version = 11 : i64} {
  func.func @_conv3x3_relu_pool_kernel(%arg0: i32, %arg1: memref<1x14x14x16xf32, #tpu.memory_space<vmem>>, %arg2: memref<144x32xbf16, #tpu.memory_space<vmem>>, %arg3: memref<1x32xf32, #tpu.memory_space<vmem>>, %arg4: memref<1x6x6x32xf32, #tpu.memory_space<vmem>>) attributes {dimension_semantics = [#tpu.dimension_semantics<parallel>], iteration_bounds = array<i64: 2>, scalar_prefetch = 0 : i64, scratch_operands = 0 : i64, tpu.core_type = #tpu.core_type<tc>, window_params = [{transform_indices = @transform_0, window_bounds = array<i64: 1, 14, 14, 16>}, {pipeline_mode = #tpu.pipeline_mode<synchronous>, transform_indices = @transform_1, window_bounds = array<i64: 144, 32>}, {pipeline_mode = #tpu.pipeline_mode<synchronous>, transform_indices = @transform_2, window_bounds = array<i64: 1, 32>}, {transform_indices = @transform_3, window_bounds = array<i64: 1, 6, 6, 32>}]} {
    %c0 = arith.constant 0 : index
    %c0_0 = arith.constant 0 : index
    %0 = vector.load %arg2[%c0, %c0_0] : memref<144x32xbf16, #tpu.memory_space<vmem>>, vector<144x32xbf16>
    %c0_1 = arith.constant 0 : index
    %c0_2 = arith.constant 0 : index
    %1 = vector.load %arg3[%c0_1, %c0_2] : memref<1x32xf32, #tpu.memory_space<vmem>>, vector<1x32xf32>
    %2 = tpu.iota {dimensions = array<i32: 0>} : vector<6x11xi32>
    %3 = tpu.iota {dimensions = array<i32: 1>} : vector<6x11xi32>
    %c2_i32 = arith.constant 2 : i32
    %4 = vector.broadcast %c2_i32 : i32 to vector<6x11xi32>
    %5 = arith.muli %4, %2 : vector<6x11xi32>
    %6 = arith.cmpi eq, %3, %5 : vector<6x11xi32>
    %7 = arith.extui %6 : vector<6x11xi1> to vector<6x11xi32>
    %8 = arith.sitofp %7 : vector<6x11xi32> to vector<6x11xf32>
    %9 = arith.truncf %8 : vector<6x11xf32> to vector<6x11xbf16>
    %c0_i32 = arith.constant 0 : i32
    %c6_i32 = arith.constant 6 : i32
    %10 = arith.addi %c0_i32, %c6_i32 : i32
    %c1_i32 = arith.constant 1 : i32
    scf.for %arg5 = %c0_i32 to %10 step %c1_i32  : i32 {
      %c2_i32_4 = arith.constant 2 : i32
      %11 = arith.muli %c2_i32_4, %arg5 : i32
      %c0_i32_5 = arith.constant 0 : i32
      %12 = arith.addi %11, %c0_i32_5 : i32
      %c0_6 = arith.constant 0 : index
      %13 = arith.index_cast %12 : i32 to index
      %c0_7 = arith.constant 0 : index
      %c0_8 = arith.constant 0 : index
      %14 = vector.load %arg1[%c0_6, %13, %c0_7, %c0_8] : memref<1x14x14x16xf32, #tpu.memory_space<vmem>>, vector<1x1x12x16xf32>
      %15 = vector.shape_cast %14 : vector<1x1x12x16xf32> to vector<12x16xf32>
      %c0_i32_9 = arith.constant 0 : i32
      %16 = arith.addi %11, %c0_i32_9 : i32
      %c0_10 = arith.constant 0 : index
      %17 = arith.index_cast %16 : i32 to index
      %c1 = arith.constant 1 : index
      %c0_11 = arith.constant 0 : index
      %18 = vector.load %arg1[%c0_10, %17, %c1, %c0_11] : memref<1x14x14x16xf32, #tpu.memory_space<vmem>>, vector<1x1x12x16xf32>
      %19 = vector.shape_cast %18 : vector<1x1x12x16xf32> to vector<12x16xf32>
      %c0_i32_12 = arith.constant 0 : i32
      %20 = arith.addi %11, %c0_i32_12 : i32
      %c0_13 = arith.constant 0 : index
      %21 = arith.index_cast %20 : i32 to index
      %c2 = arith.constant 2 : index
      %c0_14 = arith.constant 0 : index
      %22 = vector.load %arg1[%c0_13, %21, %c2, %c0_14] : memref<1x14x14x16xf32, #tpu.memory_space<vmem>>, vector<1x1x12x16xf32>
      %23 = vector.shape_cast %22 : vector<1x1x12x16xf32> to vector<12x16xf32>
      %c1_i32_15 = arith.constant 1 : i32
      %24 = arith.addi %11, %c1_i32_15 : i32
      %c0_16 = arith.constant 0 : index
      %25 = arith.index_cast %24 : i32 to index
      %c0_17 = arith.constant 0 : index
      %c0_18 = arith.constant 0 : index
      %26 = vector.load %arg1[%c0_16, %25, %c0_17, %c0_18] : memref<1x14x14x16xf32, #tpu.memory_space<vmem>>, vector<1x1x12x16xf32>
      %27 = vector.shape_cast %26 : vector<1x1x12x16xf32> to vector<12x16xf32>
      %c1_i32_19 = arith.constant 1 : i32
      %28 = arith.addi %11, %c1_i32_19 : i32
      %c0_20 = arith.constant 0 : index
      %29 = arith.index_cast %28 : i32 to index
      %c1_21 = arith.constant 1 : index
      %c0_22 = arith.constant 0 : index
      %30 = vector.load %arg1[%c0_20, %29, %c1_21, %c0_22] : memref<1x14x14x16xf32, #tpu.memory_space<vmem>>, vector<1x1x12x16xf32>
      %31 = vector.shape_cast %30 : vector<1x1x12x16xf32> to vector<12x16xf32>
      %c1_i32_23 = arith.constant 1 : i32
      %32 = arith.addi %11, %c1_i32_23 : i32
      %c0_24 = arith.constant 0 : index
      %33 = arith.index_cast %32 : i32 to index
      %c2_25 = arith.constant 2 : index
      %c0_26 = arith.constant 0 : index
      %34 = vector.load %arg1[%c0_24, %33, %c2_25, %c0_26] : memref<1x14x14x16xf32, #tpu.memory_space<vmem>>, vector<1x1x12x16xf32>
      %35 = vector.shape_cast %34 : vector<1x1x12x16xf32> to vector<12x16xf32>
      %c2_i32_27 = arith.constant 2 : i32
      %36 = arith.addi %11, %c2_i32_27 : i32
      %c0_28 = arith.constant 0 : index
      %37 = arith.index_cast %36 : i32 to index
      %c0_29 = arith.constant 0 : index
      %c0_30 = arith.constant 0 : index
      %38 = vector.load %arg1[%c0_28, %37, %c0_29, %c0_30] : memref<1x14x14x16xf32, #tpu.memory_space<vmem>>, vector<1x1x12x16xf32>
      %39 = vector.shape_cast %38 : vector<1x1x12x16xf32> to vector<12x16xf32>
      %c2_i32_31 = arith.constant 2 : i32
      %40 = arith.addi %11, %c2_i32_31 : i32
      %c0_32 = arith.constant 0 : index
      %41 = arith.index_cast %40 : i32 to index
      %c1_33 = arith.constant 1 : index
      %c0_34 = arith.constant 0 : index
      %42 = vector.load %arg1[%c0_32, %41, %c1_33, %c0_34] : memref<1x14x14x16xf32, #tpu.memory_space<vmem>>, vector<1x1x12x16xf32>
      %43 = vector.shape_cast %42 : vector<1x1x12x16xf32> to vector<12x16xf32>
      %c2_i32_35 = arith.constant 2 : i32
      %44 = arith.addi %11, %c2_i32_35 : i32
      %c0_36 = arith.constant 0 : index
      %45 = arith.index_cast %44 : i32 to index
      %c2_37 = arith.constant 2 : index
      %c0_38 = arith.constant 0 : index
      %46 = vector.load %arg1[%c0_36, %45, %c2_37, %c0_38] : memref<1x14x14x16xf32, #tpu.memory_space<vmem>>, vector<1x1x12x16xf32>
      %47 = vector.shape_cast %46 : vector<1x1x12x16xf32> to vector<12x16xf32>
      %48 = tpu.concatenate %15, %19, %23, %27, %31, %35, %39, %43, %47 in 1 : vector<12x16xf32>, vector<12x16xf32>, vector<12x16xf32>, vector<12x16xf32>, vector<12x16xf32>, vector<12x16xf32>, vector<12x16xf32>, vector<12x16xf32>, vector<12x16xf32> -> vector<12x144xf32>
      %49 = arith.truncf %48 : vector<12x144xf32> to vector<12x144xbf16>
      %cst = arith.constant dense<0.000000e+00> : vector<12x32xf32>
      %50 = tpu.matmul %49, %0, %cst {dimension_numbers = #tpu.dot_dimension_numbers<[1], [0], [0], [1], [0, 0, 1, 1], [], []>} : vector<12x144xbf16>, vector<144x32xbf16>, vector<12x32xf32> -> vector<12x32xf32>
      %c2_i32_39 = arith.constant 2 : i32
      %51 = arith.muli %c2_i32_39, %arg5 : i32
      %c1_i32_40 = arith.constant 1 : i32
      %52 = arith.addi %51, %c1_i32_40 : i32
      %c0_i32_41 = arith.constant 0 : i32
      %53 = arith.addi %52, %c0_i32_41 : i32
      %c0_42 = arith.constant 0 : index
      %54 = arith.index_cast %53 : i32 to index
      %c0_43 = arith.constant 0 : index
      %c0_44 = arith.constant 0 : index
      %55 = vector.load %arg1[%c0_42, %54, %c0_43, %c0_44] : memref<1x14x14x16xf32, #tpu.memory_space<vmem>>, vector<1x1x12x16xf32>
      %56 = vector.shape_cast %55 : vector<1x1x12x16xf32> to vector<12x16xf32>
      %c0_i32_45 = arith.constant 0 : i32
      %57 = arith.addi %52, %c0_i32_45 : i32
      %c0_46 = arith.constant 0 : index
      %58 = arith.index_cast %57 : i32 to index
      %c1_47 = arith.constant 1 : index
      %c0_48 = arith.constant 0 : index
      %59 = vector.load %arg1[%c0_46, %58, %c1_47, %c0_48] : memref<1x14x14x16xf32, #tpu.memory_space<vmem>>, vector<1x1x12x16xf32>
      %60 = vector.shape_cast %59 : vector<1x1x12x16xf32> to vector<12x16xf32>
      %c0_i32_49 = arith.constant 0 : i32
      %61 = arith.addi %52, %c0_i32_49 : i32
      %c0_50 = arith.constant 0 : index
      %62 = arith.index_cast %61 : i32 to index
      %c2_51 = arith.constant 2 : index
      %c0_52 = arith.constant 0 : index
      %63 = vector.load %arg1[%c0_50, %62, %c2_51, %c0_52] : memref<1x14x14x16xf32, #tpu.memory_space<vmem>>, vector<1x1x12x16xf32>
      %64 = vector.shape_cast %63 : vector<1x1x12x16xf32> to vector<12x16xf32>
      %c1_i32_53 = arith.constant 1 : i32
      %65 = arith.addi %52, %c1_i32_53 : i32
      %c0_54 = arith.constant 0 : index
      %66 = arith.index_cast %65 : i32 to index
      %c0_55 = arith.constant 0 : index
      %c0_56 = arith.constant 0 : index
      %67 = vector.load %arg1[%c0_54, %66, %c0_55, %c0_56] : memref<1x14x14x16xf32, #tpu.memory_space<vmem>>, vector<1x1x12x16xf32>
      %68 = vector.shape_cast %67 : vector<1x1x12x16xf32> to vector<12x16xf32>
      %c1_i32_57 = arith.constant 1 : i32
      %69 = arith.addi %52, %c1_i32_57 : i32
      %c0_58 = arith.constant 0 : index
      %70 = arith.index_cast %69 : i32 to index
      %c1_59 = arith.constant 1 : index
      %c0_60 = arith.constant 0 : index
      %71 = vector.load %arg1[%c0_58, %70, %c1_59, %c0_60] : memref<1x14x14x16xf32, #tpu.memory_space<vmem>>, vector<1x1x12x16xf32>
      %72 = vector.shape_cast %71 : vector<1x1x12x16xf32> to vector<12x16xf32>
      %c1_i32_61 = arith.constant 1 : i32
      %73 = arith.addi %52, %c1_i32_61 : i32
      %c0_62 = arith.constant 0 : index
      %74 = arith.index_cast %73 : i32 to index
      %c2_63 = arith.constant 2 : index
      %c0_64 = arith.constant 0 : index
      %75 = vector.load %arg1[%c0_62, %74, %c2_63, %c0_64] : memref<1x14x14x16xf32, #tpu.memory_space<vmem>>, vector<1x1x12x16xf32>
      %76 = vector.shape_cast %75 : vector<1x1x12x16xf32> to vector<12x16xf32>
      %c2_i32_65 = arith.constant 2 : i32
      %77 = arith.addi %52, %c2_i32_65 : i32
      %c0_66 = arith.constant 0 : index
      %78 = arith.index_cast %77 : i32 to index
      %c0_67 = arith.constant 0 : index
      %c0_68 = arith.constant 0 : index
      %79 = vector.load %arg1[%c0_66, %78, %c0_67, %c0_68] : memref<1x14x14x16xf32, #tpu.memory_space<vmem>>, vector<1x1x12x16xf32>
      %80 = vector.shape_cast %79 : vector<1x1x12x16xf32> to vector<12x16xf32>
      %c2_i32_69 = arith.constant 2 : i32
      %81 = arith.addi %52, %c2_i32_69 : i32
      %c0_70 = arith.constant 0 : index
      %82 = arith.index_cast %81 : i32 to index
      %c1_71 = arith.constant 1 : index
      %c0_72 = arith.constant 0 : index
      %83 = vector.load %arg1[%c0_70, %82, %c1_71, %c0_72] : memref<1x14x14x16xf32, #tpu.memory_space<vmem>>, vector<1x1x12x16xf32>
      %84 = vector.shape_cast %83 : vector<1x1x12x16xf32> to vector<12x16xf32>
      %c2_i32_73 = arith.constant 2 : i32
      %85 = arith.addi %52, %c2_i32_73 : i32
      %c0_74 = arith.constant 0 : index
      %86 = arith.index_cast %85 : i32 to index
      %c2_75 = arith.constant 2 : index
      %c0_76 = arith.constant 0 : index
      %87 = vector.load %arg1[%c0_74, %86, %c2_75, %c0_76] : memref<1x14x14x16xf32, #tpu.memory_space<vmem>>, vector<1x1x12x16xf32>
      %88 = vector.shape_cast %87 : vector<1x1x12x16xf32> to vector<12x16xf32>
      %89 = tpu.concatenate %56, %60, %64, %68, %72, %76, %80, %84, %88 in 1 : vector<12x16xf32>, vector<12x16xf32>, vector<12x16xf32>, vector<12x16xf32>, vector<12x16xf32>, vector<12x16xf32>, vector<12x16xf32>, vector<12x16xf32>, vector<12x16xf32> -> vector<12x144xf32>
      %90 = arith.truncf %89 : vector<12x144xf32> to vector<12x144xbf16>
      %cst_77 = arith.constant dense<0.000000e+00> : vector<12x32xf32>
      %91 = tpu.matmul %90, %0, %cst_77 {dimension_numbers = #tpu.dot_dimension_numbers<[1], [0], [0], [1], [0, 0, 1, 1], [], []>} : vector<12x144xbf16>, vector<144x32xbf16>, vector<12x32xf32> -> vector<12x32xf32>
      %92 = arith.maximumf %50, %91 : vector<12x32xf32>
      %93 = vector.extract_strided_slice %92 {offsets = [0, 0], sizes = [11, 32], strides = [1, 1]} : vector<12x32xf32> to vector<11x32xf32>
      %94 = vector.extract_strided_slice %92 {offsets = [1, 0], sizes = [11, 32], strides = [1, 1]} : vector<12x32xf32> to vector<11x32xf32>
      %95 = arith.maximumf %93, %94 : vector<11x32xf32>
      %96 = arith.truncf %95 : vector<11x32xf32> to vector<11x32xbf16>
      %cst_78 = arith.constant dense<0.000000e+00> : vector<6x32xf32>
      %97 = tpu.matmul %9, %96, %cst_78 {dimension_numbers = #tpu.dot_dimension_numbers<[1], [0], [0], [1], [0, 0, 1, 1], [], []>} : vector<6x11xbf16>, vector<11x32xbf16>, vector<6x32xf32> -> vector<6x32xf32>
      %98 = vector.broadcast %1 : vector<1x32xf32> to vector<6x32xf32>
      %99 = arith.addf %97, %98 : vector<6x32xf32>
      %cst_79 = arith.constant 0.000000e+00 : f32
      %100 = vector.broadcast %cst_79 : f32 to vector<6x32xf32>
      %101 = arith.maximumf %99, %100 : vector<6x32xf32>
      %102 = vector.shape_cast %101 : vector<6x32xf32> to vector<1x6x32xf32>
      %c0_80 = arith.constant 0 : index
      %103 = arith.index_cast %arg5 : i32 to index
      %c0_81 = arith.constant 0 : index
      %c0_82 = arith.constant 0 : index
      %104 = vector.load %arg4[%c0_80, %103, %c0_81, %c0_82] : memref<1x6x6x32xf32, #tpu.memory_space<vmem>>, vector<1x1x6x32xf32>
      %105 = vector.shape_cast %104 : vector<1x1x6x32xf32> to vector<1x6x32xf32>
      %106 = vector.shape_cast %102 : vector<1x6x32xf32> to vector<1x1x6x32xf32>
      tpu.vector_store %arg4[%c0_80, %103, %c0_81, %c0_82], %106 {strides = array<i32>} : memref<1x6x6x32xf32, #tpu.memory_space<vmem>>, vector<1x1x6x32xf32>,
    }
    %c6_i32_3 = arith.constant 6 : i32
    return
  }
  func.func @transform_0(%arg0: i32) -> (i32, i32, i32, i32) {
    %c0_i32 = arith.constant 0 : i32
    %c0_i32_0 = arith.constant 0 : i32
    %c0_i32_1 = arith.constant 0 : i32
    %c0_i32_2 = arith.constant 0 : i32
    return %arg0, %c0_i32, %c0_i32_0, %c0_i32_1 : i32, i32, i32, i32
  }
  func.func @transform_1(%arg0: i32) -> (i32, i32) {
    %c0_i32 = arith.constant 0 : i32
    %c0_i32_0 = arith.constant 0 : i32
    %c0_i32_1 = arith.constant 0 : i32
    return %c0_i32, %c0_i32_0 : i32, i32
  }
  func.func @transform_2(%arg0: i32) -> (i32, i32) {
    %c0_i32 = arith.constant 0 : i32
    %c0_i32_0 = arith.constant 0 : i32
    %c0_i32_1 = arith.constant 0 : i32
    return %c0_i32, %c0_i32_0 : i32, i32
  }
  func.func @transform_3(%arg0: i32) -> (i32, i32, i32, i32) {
    %c0_i32 = arith.constant 0 : i32
    %c0_i32_0 = arith.constant 0 : i32
    %c0_i32_1 = arith.constant 0 : i32
    %c0_i32_2 = arith.constant 0 : i32
    return %arg0, %c0_i32, %c0_i32_0, %c0_i32_1 : i32, i32, i32, i32
  }
}

module attributes {stable_mosaic.version = 11 : i64} {
  func.func @_linear_kernel(%arg0: i32, %arg1: i32, %arg2: memref<8x1152xbf16, #tpu.memory_space<vmem>>, %arg3: memref<1152x128xbf16, #tpu.memory_space<vmem>>, %arg4: memref<1x128xf32, #tpu.memory_space<vmem>>, %arg5: memref<8x128xbf16, #tpu.memory_space<vmem>>, %arg6: memref<8x128xf32, #tpu.memory_space<vmem>>) attributes {dimension_semantics = [#tpu.dimension_semantics<parallel>, #tpu.dimension_semantics<arbitrary>], iteration_bounds = array<i64: 1, 1>, scalar_prefetch = 0 : i64, scratch_operands = 1 : i64, tpu.core_type = #tpu.core_type<tc>, window_params = [{transform_indices = @transform_0, window_bounds = array<i64: 8, 1152>}, {transform_indices = @transform_1, window_bounds = array<i64: 1152, 128>}, {pipeline_mode = #tpu.pipeline_mode<synchronous>, transform_indices = @transform_2, window_bounds = array<i64: 1, 128>}, {transform_indices = @transform_3, window_bounds = array<i64: 8, 128>}]} {
    %c0_i32 = arith.constant 0 : i32
    %0 = arith.cmpi eq, %arg1, %c0_i32 : i32
    %1 = arith.extui %0 : i1 to i32
    %c0_i32_0 = arith.constant 0 : i32
    %2 = arith.cmpi ne, %1, %c0_i32_0 : i32
    scf.if %2 {
      %cst_10 = arith.constant 0.000000e+00 : f32
      %12 = vector.broadcast %cst_10 : f32 to vector<8x128xf32>
      %c0_11 = arith.constant 0 : index
      %c0_12 = arith.constant 0 : index
      %13 = vector.load %arg6[%c0_11, %c0_12] : memref<8x128xf32, #tpu.memory_space<vmem>>, vector<8x128xf32>
      tpu.vector_store %arg6[%c0_11, %c0_12], %12 {strides = array<i32>} : memref<8x128xf32, #tpu.memory_space<vmem>>, vector<8x128xf32>,
    } else {
    }
    %c0 = arith.constant 0 : index
    %c0_1 = arith.constant 0 : index
    %3 = vector.load %arg6[%c0, %c0_1] : memref<8x128xf32, #tpu.memory_space<vmem>>, vector<8x128xf32>
    %c0_2 = arith.constant 0 : index
    %c0_3 = arith.constant 0 : index
    %4 = vector.load %arg2[%c0_2, %c0_3] : memref<8x1152xbf16, #tpu.memory_space<vmem>>, vector<8x1152xbf16>
    %c0_4 = arith.constant 0 : index
    %c0_5 = arith.constant 0 : index
    %5 = vector.load %arg3[%c0_4, %c0_5] : memref<1152x128xbf16, #tpu.memory_space<vmem>>, vector<1152x128xbf16>
    %cst = arith.constant dense<0.000000e+00> : vector<8x128xf32>
    %6 = tpu.matmul %4, %5, %cst {dimension_numbers = #tpu.dot_dimension_numbers<[1], [0], [0], [1], [0, 0, 1, 1], [], []>} : vector<8x1152xbf16>, vector<1152x128xbf16>, vector<8x128xf32> -> vector<8x128xf32>
    %7 = arith.addf %3, %6 : vector<8x128xf32>
    %c0_6 = arith.constant 0 : index
    %c0_7 = arith.constant 0 : index
    %8 = vector.load %arg6[%c0_6, %c0_7] : memref<8x128xf32, #tpu.memory_space<vmem>>, vector<8x128xf32>
    tpu.vector_store %arg6[%c0_6, %c0_7], %7 {strides = array<i32>} : memref<8x128xf32, #tpu.memory_space<vmem>>, vector<8x128xf32>,
    %c0_i32_8 = arith.constant 0 : i32
    %9 = arith.cmpi eq, %arg1, %c0_i32_8 : i32
    %10 = arith.extui %9 : i1 to i32
    %c0_i32_9 = arith.constant 0 : i32
    %11 = arith.cmpi ne, %10, %c0_i32_9 : i32
    scf.if %11 {
      %c0_10 = arith.constant 0 : index
      %c0_11 = arith.constant 0 : index
      %12 = vector.load %arg6[%c0_10, %c0_11] : memref<8x128xf32, #tpu.memory_space<vmem>>, vector<8x128xf32>
      %c0_12 = arith.constant 0 : index
      %c0_13 = arith.constant 0 : index
      %13 = vector.load %arg4[%c0_12, %c0_13] : memref<1x128xf32, #tpu.memory_space<vmem>>, vector<1x128xf32>
      %14 = vector.broadcast %13 : vector<1x128xf32> to vector<8x128xf32>
      %15 = arith.addf %12, %14 : vector<8x128xf32>
      %cst_14 = arith.constant 0.000000e+00 : f32
      %16 = vector.broadcast %cst_14 : f32 to vector<8x128xf32>
      %17 = arith.maximumf %15, %16 : vector<8x128xf32>
      %18 = arith.truncf %17 : vector<8x128xf32> to vector<8x128xbf16>
      %c0_15 = arith.constant 0 : index
      %c0_16 = arith.constant 0 : index
      %19 = vector.load %arg5[%c0_15, %c0_16] : memref<8x128xbf16, #tpu.memory_space<vmem>>, vector<8x128xbf16>
      tpu.vector_store %arg5[%c0_15, %c0_16], %18 {strides = array<i32>} : memref<8x128xbf16, #tpu.memory_space<vmem>>, vector<8x128xbf16>,
    } else {
    }
    return
  }
  func.func @transform_0(%arg0: i32, %arg1: i32) -> (i32, i32) {
    %c0_i32 = arith.constant 0 : i32
    return %arg0, %arg1 : i32, i32
  }
  func.func @transform_1(%arg0: i32, %arg1: i32) -> (i32, i32) {
    %c0_i32 = arith.constant 0 : i32
    %c0_i32_0 = arith.constant 0 : i32
    return %arg1, %c0_i32 : i32, i32
  }
  func.func @transform_2(%arg0: i32, %arg1: i32) -> (i32, i32) {
    %c0_i32 = arith.constant 0 : i32
    %c0_i32_0 = arith.constant 0 : i32
    %c0_i32_1 = arith.constant 0 : i32
    return %c0_i32, %c0_i32_0 : i32, i32
  }
  func.func @transform_3(%arg0: i32, %arg1: i32) -> (i32, i32) {
    %c0_i32 = arith.constant 0 : i32
    %c0_i32_0 = arith.constant 0 : i32
    return %arg0, %c0_i32 : i32, i32
  }
}

module attributes {stable_mosaic.version = 11 : i64} {
  func.func @_linear_kernel(%arg0: i32, %arg1: i32, %arg2: memref<8x128xbf16, #tpu.memory_space<vmem>>, %arg3: memref<128x64xbf16, #tpu.memory_space<vmem>>, %arg4: memref<1x64xf32, #tpu.memory_space<vmem>>, %arg5: memref<8x64xbf16, #tpu.memory_space<vmem>>, %arg6: memref<8x64xf32, #tpu.memory_space<vmem>>) attributes {dimension_semantics = [#tpu.dimension_semantics<parallel>, #tpu.dimension_semantics<arbitrary>], iteration_bounds = array<i64: 1, 1>, scalar_prefetch = 0 : i64, scratch_operands = 1 : i64, tpu.core_type = #tpu.core_type<tc>, window_params = [{transform_indices = @transform_0, window_bounds = array<i64: 8, 128>}, {transform_indices = @transform_1, window_bounds = array<i64: 128, 64>}, {pipeline_mode = #tpu.pipeline_mode<synchronous>, transform_indices = @transform_2, window_bounds = array<i64: 1, 64>}, {transform_indices = @transform_3, window_bounds = array<i64: 8, 64>}]} {
    %c0_i32 = arith.constant 0 : i32
    %0 = arith.cmpi eq, %arg1, %c0_i32 : i32
    %1 = arith.extui %0 : i1 to i32
    %c0_i32_0 = arith.constant 0 : i32
    %2 = arith.cmpi ne, %1, %c0_i32_0 : i32
    scf.if %2 {
      %cst_10 = arith.constant 0.000000e+00 : f32
      %12 = vector.broadcast %cst_10 : f32 to vector<8x64xf32>
      %c0_11 = arith.constant 0 : index
      %c0_12 = arith.constant 0 : index
      %13 = vector.load %arg6[%c0_11, %c0_12] : memref<8x64xf32, #tpu.memory_space<vmem>>, vector<8x64xf32>
      tpu.vector_store %arg6[%c0_11, %c0_12], %12 {strides = array<i32>} : memref<8x64xf32, #tpu.memory_space<vmem>>, vector<8x64xf32>,
    } else {
    }
    %c0 = arith.constant 0 : index
    %c0_1 = arith.constant 0 : index
    %3 = vector.load %arg6[%c0, %c0_1] : memref<8x64xf32, #tpu.memory_space<vmem>>, vector<8x64xf32>
    %c0_2 = arith.constant 0 : index
    %c0_3 = arith.constant 0 : index
    %4 = vector.load %arg2[%c0_2, %c0_3] : memref<8x128xbf16, #tpu.memory_space<vmem>>, vector<8x128xbf16>
    %c0_4 = arith.constant 0 : index
    %c0_5 = arith.constant 0 : index
    %5 = vector.load %arg3[%c0_4, %c0_5] : memref<128x64xbf16, #tpu.memory_space<vmem>>, vector<128x64xbf16>
    %cst = arith.constant dense<0.000000e+00> : vector<8x64xf32>
    %6 = tpu.matmul %4, %5, %cst {dimension_numbers = #tpu.dot_dimension_numbers<[1], [0], [0], [1], [0, 0, 1, 1], [], []>} : vector<8x128xbf16>, vector<128x64xbf16>, vector<8x64xf32> -> vector<8x64xf32>
    %7 = arith.addf %3, %6 : vector<8x64xf32>
    %c0_6 = arith.constant 0 : index
    %c0_7 = arith.constant 0 : index
    %8 = vector.load %arg6[%c0_6, %c0_7] : memref<8x64xf32, #tpu.memory_space<vmem>>, vector<8x64xf32>
    tpu.vector_store %arg6[%c0_6, %c0_7], %7 {strides = array<i32>} : memref<8x64xf32, #tpu.memory_space<vmem>>, vector<8x64xf32>,
    %c0_i32_8 = arith.constant 0 : i32
    %9 = arith.cmpi eq, %arg1, %c0_i32_8 : i32
    %10 = arith.extui %9 : i1 to i32
    %c0_i32_9 = arith.constant 0 : i32
    %11 = arith.cmpi ne, %10, %c0_i32_9 : i32
    scf.if %11 {
      %c0_10 = arith.constant 0 : index
      %c0_11 = arith.constant 0 : index
      %12 = vector.load %arg6[%c0_10, %c0_11] : memref<8x64xf32, #tpu.memory_space<vmem>>, vector<8x64xf32>
      %c0_12 = arith.constant 0 : index
      %c0_13 = arith.constant 0 : index
      %13 = vector.load %arg4[%c0_12, %c0_13] : memref<1x64xf32, #tpu.memory_space<vmem>>, vector<1x64xf32>
      %14 = vector.broadcast %13 : vector<1x64xf32> to vector<8x64xf32>
      %15 = arith.addf %12, %14 : vector<8x64xf32>
      %cst_14 = arith.constant 0.000000e+00 : f32
      %16 = vector.broadcast %cst_14 : f32 to vector<8x64xf32>
      %17 = arith.maximumf %15, %16 : vector<8x64xf32>
      %18 = arith.truncf %17 : vector<8x64xf32> to vector<8x64xbf16>
      %c0_15 = arith.constant 0 : index
      %c0_16 = arith.constant 0 : index
      %19 = vector.load %arg5[%c0_15, %c0_16] : memref<8x64xbf16, #tpu.memory_space<vmem>>, vector<8x64xbf16>
      tpu.vector_store %arg5[%c0_15, %c0_16], %18 {strides = array<i32>} : memref<8x64xbf16, #tpu.memory_space<vmem>>, vector<8x64xbf16>,
    } else {
    }
    return
  }
  func.func @transform_0(%arg0: i32, %arg1: i32) -> (i32, i32) {
    %c0_i32 = arith.constant 0 : i32
    return %arg0, %arg1 : i32, i32
  }
  func.func @transform_1(%arg0: i32, %arg1: i32) -> (i32, i32) {
    %c0_i32 = arith.constant 0 : i32
    %c0_i32_0 = arith.constant 0 : i32
    return %arg1, %c0_i32 : i32, i32
  }
  func.func @transform_2(%arg0: i32, %arg1: i32) -> (i32, i32) {
    %c0_i32 = arith.constant 0 : i32
    %c0_i32_0 = arith.constant 0 : i32
    %c0_i32_1 = arith.constant 0 : i32
    return %c0_i32, %c0_i32_0 : i32, i32
  }
  func.func @transform_3(%arg0: i32, %arg1: i32) -> (i32, i32) {
    %c0_i32 = arith.constant 0 : i32
    %c0_i32_0 = arith.constant 0 : i32
    return %arg0, %c0_i32 : i32, i32
  }
}

module attributes {stable_mosaic.version = 11 : i64} {
  func.func @_linear_kernel(%arg0: i32, %arg1: i32, %arg2: memref<8x128xbf16, #tpu.memory_space<vmem>>, %arg3: memref<128x54xbf16, #tpu.memory_space<vmem>>, %arg4: memref<1x54xf32, #tpu.memory_space<vmem>>, %arg5: memref<8x54xf32, #tpu.memory_space<vmem>>, %arg6: memref<8x54xf32, #tpu.memory_space<vmem>>) attributes {dimension_semantics = [#tpu.dimension_semantics<parallel>, #tpu.dimension_semantics<arbitrary>], iteration_bounds = array<i64: 1, 1>, scalar_prefetch = 0 : i64, scratch_operands = 1 : i64, tpu.core_type = #tpu.core_type<tc>, window_params = [{transform_indices = @transform_0, window_bounds = array<i64: 8, 128>}, {transform_indices = @transform_1, window_bounds = array<i64: 128, 54>}, {pipeline_mode = #tpu.pipeline_mode<synchronous>, transform_indices = @transform_2, window_bounds = array<i64: 1, 54>}, {transform_indices = @transform_3, window_bounds = array<i64: 8, 54>}]} {
    %c0_i32 = arith.constant 0 : i32
    %0 = arith.cmpi eq, %arg1, %c0_i32 : i32
    %1 = arith.extui %0 : i1 to i32
    %c0_i32_0 = arith.constant 0 : i32
    %2 = arith.cmpi ne, %1, %c0_i32_0 : i32
    scf.if %2 {
      %cst_10 = arith.constant 0.000000e+00 : f32
      %12 = vector.broadcast %cst_10 : f32 to vector<8x54xf32>
      %c0_11 = arith.constant 0 : index
      %c0_12 = arith.constant 0 : index
      %13 = vector.load %arg6[%c0_11, %c0_12] : memref<8x54xf32, #tpu.memory_space<vmem>>, vector<8x54xf32>
      tpu.vector_store %arg6[%c0_11, %c0_12], %12 {strides = array<i32>} : memref<8x54xf32, #tpu.memory_space<vmem>>, vector<8x54xf32>,
    } else {
    }
    %c0 = arith.constant 0 : index
    %c0_1 = arith.constant 0 : index
    %3 = vector.load %arg6[%c0, %c0_1] : memref<8x54xf32, #tpu.memory_space<vmem>>, vector<8x54xf32>
    %c0_2 = arith.constant 0 : index
    %c0_3 = arith.constant 0 : index
    %4 = vector.load %arg2[%c0_2, %c0_3] : memref<8x128xbf16, #tpu.memory_space<vmem>>, vector<8x128xbf16>
    %c0_4 = arith.constant 0 : index
    %c0_5 = arith.constant 0 : index
    %5 = vector.load %arg3[%c0_4, %c0_5] : memref<128x54xbf16, #tpu.memory_space<vmem>>, vector<128x54xbf16>
    %cst = arith.constant dense<0.000000e+00> : vector<8x54xf32>
    %6 = tpu.matmul %4, %5, %cst {dimension_numbers = #tpu.dot_dimension_numbers<[1], [0], [0], [1], [0, 0, 1, 1], [], []>} : vector<8x128xbf16>, vector<128x54xbf16>, vector<8x54xf32> -> vector<8x54xf32>
    %7 = arith.addf %3, %6 : vector<8x54xf32>
    %c0_6 = arith.constant 0 : index
    %c0_7 = arith.constant 0 : index
    %8 = vector.load %arg6[%c0_6, %c0_7] : memref<8x54xf32, #tpu.memory_space<vmem>>, vector<8x54xf32>
    tpu.vector_store %arg6[%c0_6, %c0_7], %7 {strides = array<i32>} : memref<8x54xf32, #tpu.memory_space<vmem>>, vector<8x54xf32>,
    %c0_i32_8 = arith.constant 0 : i32
    %9 = arith.cmpi eq, %arg1, %c0_i32_8 : i32
    %10 = arith.extui %9 : i1 to i32
    %c0_i32_9 = arith.constant 0 : i32
    %11 = arith.cmpi ne, %10, %c0_i32_9 : i32
    scf.if %11 {
      %c0_10 = arith.constant 0 : index
      %c0_11 = arith.constant 0 : index
      %12 = vector.load %arg6[%c0_10, %c0_11] : memref<8x54xf32, #tpu.memory_space<vmem>>, vector<8x54xf32>
      %c0_12 = arith.constant 0 : index
      %c0_13 = arith.constant 0 : index
      %13 = vector.load %arg4[%c0_12, %c0_13] : memref<1x54xf32, #tpu.memory_space<vmem>>, vector<1x54xf32>
      %14 = vector.broadcast %13 : vector<1x54xf32> to vector<8x54xf32>
      %15 = arith.addf %12, %14 : vector<8x54xf32>
      %c0_14 = arith.constant 0 : index
      %c0_15 = arith.constant 0 : index
      %16 = vector.load %arg5[%c0_14, %c0_15] : memref<8x54xf32, #tpu.memory_space<vmem>>, vector<8x54xf32>
      tpu.vector_store %arg5[%c0_14, %c0_15], %15 {strides = array<i32>} : memref<8x54xf32, #tpu.memory_space<vmem>>, vector<8x54xf32>,
    } else {
    }
    return
  }
  func.func @transform_0(%arg0: i32, %arg1: i32) -> (i32, i32) {
    %c0_i32 = arith.constant 0 : i32
    return %arg0, %arg1 : i32, i32
  }
  func.func @transform_1(%arg0: i32, %arg1: i32) -> (i32, i32) {
    %c0_i32 = arith.constant 0 : i32
    %c0_i32_0 = arith.constant 0 : i32
    return %arg1, %c0_i32 : i32, i32
  }
  func.func @transform_2(%arg0: i32, %arg1: i32) -> (i32, i32) {
    %c0_i32 = arith.constant 0 : i32
    %c0_i32_0 = arith.constant 0 : i32
    %c0_i32_1 = arith.constant 0 : i32
    return %c0_i32, %c0_i32_0 : i32, i32
  }
  func.func @transform_3(%arg0: i32, %arg1: i32) -> (i32, i32) {
    %c0_i32 = arith.constant 0 : i32
    %c0_i32_0 = arith.constant 0 : i32
    return %arg0, %c0_i32 : i32, i32
  }
}

</mosaic_0001>

<bundles_post_ra>
// kernel: neuralnet_forward.5
= control target key start
LH: loop header
LB: loop body
LE: loop exit
PB: predicated region body
PF: predicated region fallthrough
CT: control target
= control target key end

     0   :  { %s1202_s12 = smov 0   ;;  %s1478_s0 = inlined_call_operand.vmem [shape: f32[2,30,30,3], index: 0, kind: input, shape index: {}]   ;;  %s1479_s1 = inlined_call_operand.vmem [shape: bf16[27,16], index: 1, kind: input, shape index: {}]   ;;  %s1480_s2 = inlined_call_operand.vmem [shape: f32[1,16], index: 2, kind: input, shape index: {}]   ;;  %s1481_s3 = inlined_call_operand.vmem [shape: f32[2,14,14,16], index: 3, kind: output, shape index: {}]  }
   0x1 LB: > { %s861_s13 = sadd.s32 4294967295, %s1164_s12   ;;  %p865_p0 = scmp.ge.s32.totalorder %s1164_s12, 1  ;;  %s1164_s12 = sphi %s1202_s12, %s13_s12  }
   0x2   : > { %p137_p1 = scmp.lt.s32.totalorder %s1164_s12, 3 }
   0x4   : > { %p138_p2 = pnand %p865_p0, %p137_p1 }
   0x5   : > { %p161_p3 = scmp.lt.s32.totalorder (!%p138_p2), %s861_s13, 1  ;;  %s1251_s5 = smov (!%p138_p2), 0  }
   0x6   : > { %141 = sbr.rel (%p138_p2) target bundleno = 625 (0x271), region = 32 }
   0xb   : > { %v1213_v0 = vld [vmem:[%s1479_s1] sm:$0xf]  ;;  %v1218_v1 = vld [vmem:[%s1479_s1 + $0x4] sm:$0xf]  ;;  %v177_v2 = vlaneseq  ;;  %v1223_v3 = vld [vmem:[%s1479_s1 + $0x8] sm:$0xf] }
   0xc   : > { %v1228_v4 = vld [vmem:[%s1479_s1 + $0xc] sm:$0x3]  ;;  %v1233_v5 = vld [vmem:[%s1480_s2] ss:$0 sm:$0xff]  ;;  %s1483_s13 = smov (!%p161_p3, %s861_s13), 1  ;;  %v1170_v11 = vmov 0.0  }
   0xd   : > { %v178_v6 = vshrl.u32 %v177_v2, 7  ;;  %v181_v7 = vand.u32 127, %v177_v2  ;;  %s964_s24 = smul.u32 960, %s1483_s13 }
   0xe   : > { %s965_s25 = smul.u32 224, %s1483_s13 }
   0xf   : > { %v179_v8 = vadd.s32 8, %v178_v6  ;;  %v182_v9 = vmul.u32 2, %v178_v6  ;;  %s1238_s28 = scalar_lea.vmem %s1478_s0, %s964_s24 }
  0x10   : > { %s1243_s4 = scalar_lea.vmem %s1481_s3, %s965_s25 }
  0x11   : > { %v183_v10 = vmul.u32 2, %v179_v8  ;;  %vm184_vm0 = vcmp.eq.s32.totalorder %v181_v7, %v182_v9 }
  0x12   : > { %v1245_v12 = vsel %vm184_vm0, 1.0, %v1170_v11 }
  0x13   : > { %vm185_vm1 = vcmp.eq.s32.totalorder %v181_v7, %v183_v10 }
  0x14   : > { %v1247_v13 = vsel %vm185_vm1, 1.0, %v1170_v11 }
  0x15   : > { %v190_v14 = vpack.c.bf16 %v1247_v13, %v1245_v12 }
  0x16 LB: >> { %s925_s6 = sshll.u32 %s1168_s5, 6  ;;  %s1171_s8 = smov 3   ;;  %vm430_vm2 = vcmask 1044480   ;;  %v901_v9 = vcombine.low %v1223_v3, %v1228_v4  ;;  %vm431_vm3 = vcmask 1045504   ;;  %v1177_v10 = vmov 65535   ;;  %s1168_s5 = sphi %s1251_s5, %s196_s5  }
  0x17   : >> { %s1258_s7 = scalar_lea.vmem %s1238_s28, %s925_s6  ;;  %s1172_s9 = smov 6   ;;  %v432_v11 = vsel %vm430_vm2, 4294967295, %v1177_v10  ;;  %vm370_vm4 = vcmask 23552   ;;  %vm375_vm5 = vcmask 48128   ;;  %vm380_vm6 = vcmask 72704  }
  0x18   : >> { %v206_v15 = vld [vmem:[%s1258_s7 + $0x11] sm:$0xff]  ;;  %v207_v16 = vld [vmem:[%s1258_s7 + $0x19] sm:$0xf]  ;;  %v204_v17 = vld [vmem:[%s1258_s7 + $0x1] sm:$0xff]  ;;  %s1173_s10 = smov 9   ;;  %s1174_s11 = smov 12  }
  0x19   : >> { %v1004_v18 = vpack.i.bf16 %v207_v16, %v206_v15  ;;  %v205_v19 = vld [vmem:[%s1258_s7 + $0x9] sm:$0xff]  ;;  %v878_v23 = vld [vmem:[%s1258_s7 + $0x21] sm:$0xff]  ;;  %v880_v29 = vld [vmem:[%s1258_s7 + $0x31] sm:$0xff]  ;;  %s1175_s13 = smov 15   ;;  %s1176_s14 = smov 18   ;;  %vm385_vm7 = vcmask 97280  }
  0x1a   : >> { %v208_v20 = vld [vmem:[%s1258_s7 + $0x2] sm:$0xff]  ;;  %v209_v21 = vld [vmem:[%s1258_s7 + $0xa] sm:$0xff]  ;;  %v994_v22 = vpack.i.bf16 %v205_v19, %v204_v17  ;;  %v881_v30 = vld [vmem:[%s1258_s7 + $0x39] sm:$0xf]  ;;  %v1312_v17 = vsel %vm431_vm3, %v432_v11, 0  ;;  %s1178_s15 = smov 21  }
  0x1b   : >> { %v879_v24 = vld [vmem:[%s1258_s7 + $0x29] sm:$0xff]  ;;  %1005 = vrot.lane.b32.xlu1 %v1004_v18, %s1171_s8  ;;  %v1009_v25 = vpack.i.bf16 %v209_v21, %v208_v20  ;;  %v1014_v32 = vpack.i.bf16 %v881_v30, %v880_v29  ;;  %v1273_v33 = vld [vmem:[%s1258_s7 + $0x20] sm:$0xff]  ;;  %v210_v35 = vld [vmem:[%s1258_s7 + $0x12] sm:$0xff]  ;;  %v435_v18 = vand.u32 %v901_v9, %v1312_v17  ;;  %v900_v21 = vcombine.low %v1213_v0, %v1218_v1  ;;  %s1179_s16 = smov 24   ;;  %s922_s17 = sshll.u32 %s1168_s5, 4 }
  0x1c   : >> { %995 = vrot.lane.b32.xlu0 %v994_v22, %s1171_s8  ;;  %v999_v26 = vpack.i.bf16 %v879_v24, %v878_v23  ;;  %v882_v27 = vld [vmem:[%s1258_s7 + $0x22] sm:$0xff]  ;;  %v883_v28 = vld [vmem:[%s1258_s7 + $0x2a] sm:$0xff]  ;;  %v211_v36 = vld [vmem:[%s1258_s7 + $0x1a] sm:$0xf]  ;;  %vm390_vm8 = vcmask 121856   ;;  %vm395_vm9 = vcmask 146432   ;;  %s780_s18 = scalar_lea.vmem %s1243_s4, %s922_s17 }
  0x1d   : >> { %v1019_v31 = vpack.i.bf16 %v883_v28, %v882_v27  ;;  %v1276_v34 = vld [vmem:[%s1258_s7 + $0x28] sm:$0xff]  ;;  %v1024_v38 = vpack.i.bf16 %v211_v36, %v210_v35  ;;  %v888_v39 = vld [vmem:[%s1258_s7 + $0x40] sm:$0xff]  ;;  %v884_v41 = vld [vmem:[%s1258_s7 + $0x32] sm:$0xff]  ;;  %940 = vmatprep.subr.bf16.mxu0 %v435_v18  ;;  %948 = vmatprep.subr.bf16.mxu1 %v435_v18  ;;  %vm400_vm10 = vcmask 171008   ;;  %vm405_vm11 = vcmask 195584   ;;  %s196_s5 = sadd.s32 1, %s1168_s5  }
  0x1e   : >> { %v1029_v37 = vpack.i.bf16 %v1276_v34, %v1273_v33  ;;  %v889_v40 = vld [vmem:[%s1258_s7 + $0x48] sm:$0xff]  ;;  %v885_v42 = vld [vmem:[%s1258_s7 + $0x3a] sm:$0xf]  ;;  %v1287_v45 = vld [vmem:[%s1258_s7 + $0x30] sm:$0xff]  ;;  %941 = vmatpush3.bf16.msra.mxu0 %v435_v18  ;;  %949 = vmatpush3.bf16.msra.mxu1 %v435_v18  ;;  %vm423_vm12 = vcmask 220160   ;;  %vm1181_vm13 = vmmov 0  }
  0x1f   : >> { %1010 = vrot.lane.b32.xlu1 %v1009_v25, %s1172_s9  ;;  %v1039_v43 = vpack.i.bf16 %v889_v40, %v888_v39  ;;  %v1034_v44 = vpack.i.bf16 %v885_v42, %v884_v41  ;;  %v1290_v46 = vld [vmem:[%s1258_s7 + $0x38] sm:$0xf]  ;;  %v892_v48 = vld [vmem:[%s1258_s7 + $0x41] sm:$0xff]  ;;  %v893_v49 = vld [vmem:[%s1258_s7 + $0x49] sm:$0xff]  ;;  %942 = vmatprep.subr.bf16.mxu0 %v900_v21  ;;  %vm706_vm14 = vcmask 1046528   ;;  %vm781_vm15 = vcmask 130048  }
  0x20   : >> { %1000 = vrot.lane.b32.xlu0 %v999_v26, %s1171_s8  ;;  %v1044_v47 = vpack.i.bf16 %v1290_v46, %v1287_v45  ;;  %v890_v50 = vld [vmem:[%s1258_s7 + $0x50] sm:$0xff]  ;;  %v891_v51 = vld [vmem:[%s1258_s7 + $0x58] sm:$0xf]  ;;  %v1059_v52 = vpack.i.bf16 %v893_v49, %v892_v48  ;;  %v896_v54 = vld [vmem:[%s1258_s7 + $0x42] sm:$0xff]  ;;  %950 = vmatprep.subr.bf16.mxu1 %v900_v21  ;;  %vm783_vm0 = vcmask 128000   ;;  %p193_p4 = scmp.ge.s32.totalorder %s196_s5, 14  }
  0x21   : >> { %v1054_v53 = vpack.i.bf16 %v891_v51, %v890_v50  ;;  %v897_v55 = vld [vmem:[%s1258_s7 + $0x4a] sm:$0xff]  ;;  %v895_v57 = vld [vmem:[%s1258_s7 + $0x59] sm:$0xf]  ;;  %v906_v60 = vld [vmem:[%s1258_s7 + $0x60] sm:$0xff] }
  0x22   : >> { %v894_v56 = vld [vmem:[%s1258_s7 + $0x51] sm:$0xff]  ;;  %v1079_v58 = vpack.i.bf16 %v897_v55, %v896_v54  ;;  %v907_v61 = vld [vmem:[%s1258_s7 + $0x68] sm:$0xff]  ;;  %v899_v63 = vld [vmem:[%s1258_s7 + $0x5a] sm:$0xf]  ;;  %943 = vmatpush3.bf16.msra.mxu0 %v900_v21  ;;  %951 = vmatpush3.bf16.msra.mxu1 %v900_v21 }
  0x23   : >> { %1020 = vrot.lane.b32.xlu1 %v1019_v31, %s1172_s9  ;;  %v1074_v59 = vpack.i.bf16 %v895_v57, %v894_v56  ;;  %v898_v62 = vld [vmem:[%s1258_s7 + $0x52] sm:$0xff]  ;;  %v1099_v2 = vpack.i.bf16 %v907_v61, %v906_v60  ;;  %v910_v7 = vld [vmem:[%s1258_s7 + $0x61] sm:$0xff]  ;;  %v911_v8 = vld [vmem:[%s1258_s7 + $0x69] sm:$0xff] }
  0x24   : >> { %1015 = vrot.lane.b32.xlu0 %v1014_v32, %s1171_s8  ;;  %v1094_v6 = vpack.i.bf16 %v899_v63, %v898_v62  ;;  %v908_v15 = vld [vmem:[%s1258_s7 + $0x70] sm:$0xff]  ;;  %v909_v16 = vld [vmem:[%s1258_s7 + $0x78] sm:$0xf]  ;;  %v1119_v19 = vpack.i.bf16 %v911_v8, %v910_v7  ;;  %v914_v22 = vld [vmem:[%s1258_s7 + $0x62] sm:$0xff] }
  0x25   : >> { %v1114_v20 = vpack.i.bf16 %v909_v16, %v908_v15  ;;  %v915_v23 = vld [vmem:[%s1258_s7 + $0x6a] sm:$0xff]  ;;  %v913_v25 = vld [vmem:[%s1258_s7 + $0x79] sm:$0xf]  ;;  %v200_v57 = vld [vmem:[%s1258_s7] sm:$0xff] }
  0x26   : >> { %v912_v24 = vld [vmem:[%s1258_s7 + $0x71] sm:$0xff]  ;;  %v917_v29 = vld [vmem:[%s1258_s7 + $0x7a] sm:$0xf] }
  0x27   : >> { %1030 = vrot.lane.b32.xlu1 %v1029_v37, %s1173_s10  ;;  %v1134_v27 = vpack.i.bf16 %v913_v25, %v912_v24  ;;  %v916_v28 = vld [vmem:[%s1258_s7 + $0x72] sm:$0xff] }
  0x28   : >> { %1025 = vrot.lane.b32.xlu0 %v1024_v38, %s1172_s9  ;;  %v1149_v30 = vpack.i.bf16 %v917_v29, %v916_v28  ;;  %v203_v54 = vld [vmem:[%s1258_s7 + $0x18] sm:$0xf] }
  0x2b   : >> { %1040 = vrot.lane.b32.xlu1 %v1039_v43, %s1173_s10 }
  0x2c   : >> { %1035 = vrot.lane.b32.xlu0 %v1034_v44, %s1172_s9 }
  0x2f   : >> { %1050 = vrot.lane.b32.xlu1 %v999_v26, %s1174_s11  ;;  %v1139_v26 = vpack.i.bf16 %v915_v23, %v914_v22 }
  0x30   : >> { %1045 = vrot.lane.b32.xlu0 %v1044_v47, %s1173_s10 }
  0x33   : >> { %1060 = vrot.lane.b32.xlu1 %v1059_v52, %s1174_s11 }
  0x34   : >> { %1055 = vrot.lane.b32.xlu0 %v1054_v53, %s1173_s10 }
  0x37   : >> { %1070 = vrot.lane.b32.xlu1 %v1019_v31, %s1175_s13 }
  0x38   : >> { %1065 = vrot.lane.b32.xlu0 %v1014_v32, %s1174_s11 }
  0x3b   : >> { %1080 = vrot.lane.b32.xlu1 %v1079_v58, %s1175_s13 }
  0x3c   : >> { %1075 = vrot.lane.b32.xlu0 %v1074_v59, %s1174_s11 }
  0x3f   : >> { %1090 = vrot.lane.b32.xlu1 %v1039_v43, %s1176_s14 }
  0x40   : >> { %1085 = vrot.lane.b32.xlu0 %v1034_v44, %s1175_s13 }
  0x43   : >> { %1100 = vrot.lane.b32.xlu1 %v1099_v2, %s1176_s14 }
  0x44   : >> { %1095 = vrot.lane.b32.xlu0 %v1094_v6, %s1175_s13 }
  0x47   : >> { %1110 = vrot.lane.b32.xlu1 %v1059_v52, %s1178_s15 }
  0x48   : >> { %1105 = vrot.lane.b32.xlu0 %v1054_v53, %s1176_s14  ;;  %v202_v53 = vld [vmem:[%s1258_s7 + $0x10] sm:$0xff] }
  0x4b   : >> { %1120 = vrot.lane.b32.xlu1 %v1119_v19, %s1178_s15 }
  0x4c   : >> { %1115 = vrot.lane.b32.xlu0 %v1114_v20, %s1176_s14 }
  0x4f   : >> { %1130 = vrot.lane.b32.xlu1 %v1079_v58, %s1179_s16  ;;  %v201_v58 = vld [vmem:[%s1258_s7 + $0x8] sm:$0xff] }
  0x50   : >> { %1125 = vrot.lane.b32.xlu0 %v1074_v59, %s1178_s15 }
  0x53   : >> { %1140 = vrot.lane.b32.xlu1 %v1139_v26, %s1179_s16 }
  0x54   : >> { %1135 = vrot.lane.b32.xlu0 %v1134_v27, %s1178_s15 }
  0x57   : >> { %1150 = vrot.lane.b32.xlu1 %v1149_v30, %s1179_s16 }
  0x58   : >> { %1145 = vrot.lane.b32.xlu0 %v1094_v6, %s1179_s16 }
  0x8d   : >> { %v1006_v31 = vpop.permute.xlu1 %1005 }
  0x8e   : >> { %v996_v32 = vpop.permute.xlu0 %995  ;;  %v1008_v51 = vunpack.i.h.bf16 %v1006_v31  ;;  %v1007_v52 = vunpack.i.l.bf16 %v1006_v31 }
  0x8f   : >> { %v998_v55 = vunpack.i.h.bf16 %v996_v32  ;;  %v997_v56 = vunpack.i.l.bf16 %v996_v32 }
  0x90   : >> { %v373_v6 = vsel %vm370_vm4, %v202_v53, %v1007_v52  ;;  %v374_v7 = vsel %vm370_vm4, %v203_v54, %v1008_v51 }
  0x91   : >> { %v1011_v35 = vpop.permute.xlu1 %1010  ;;  %v371_v10 = vsel %vm370_vm4, %v200_v57, %v997_v56  ;;  %v372_v11 = vsel %vm370_vm4, %v201_v58, %v998_v55 }
  0x92   : >> { %v1001_v36 = vpop.permute.xlu0 %1000  ;;  %v1013_v59 = vunpack.i.h.bf16 %v1011_v35  ;;  %v1012_v60 = vunpack.i.l.bf16 %v1011_v35 }
  0x93   : >> { %v1003_v61 = vunpack.i.h.bf16 %v1001_v36  ;;  %v1002_v63 = vunpack.i.l.bf16 %v1001_v36 }
  0x94   : >> { %v376_v18 = vsel %vm375_vm5, %v371_v10, %v1012_v60  ;;  %v377_v19 = vsel %vm375_vm5, %v372_v11, %v1013_v59 }
  0x95   : >> { %v1021_v37 = vpop.permute.xlu1 %1020  ;;  %v610_v20 = vsel %vm370_vm4, %v1276_v34, %v1003_v61  ;;  %v609_v23 = vsel %vm370_vm4, %v1273_v33, %v1002_v63 }
  0x96   : >> { %v1016_v38 = vpop.permute.xlu0 %1015  ;;  %v1023_v8 = vunpack.i.h.bf16 %v1021_v37  ;;  %v1022_v9 = vunpack.i.l.bf16 %v1021_v37 }
  0x97   : >> { %v1018_v15 = vunpack.i.h.bf16 %v1016_v38  ;;  %v1017_v16 = vunpack.i.l.bf16 %v1016_v38 }
  0x98   : >> { %v613_v28 = vsel %vm375_vm5, %v609_v23, %v1022_v9  ;;  %v614_v29 = vsel %vm375_vm5, %v610_v20, %v1023_v8 }
  0x99   : >> { %v1031_v39 = vpop.permute.xlu1 %1030  ;;  %v612_v31 = vsel %vm370_vm4, %v1290_v46, %v1018_v15  ;;  %v611_v33 = vsel %vm370_vm4, %v1287_v45, %v1017_v16 }
  0x9a   : >> { %v1323_v40 = vpop.permute.xlu0 %1025  ;;  %v1032_v21 = vunpack.i.l.bf16 %v1031_v39  ;;  %v1033_v24 = vunpack.i.h.bf16 %v1031_v39 }
  0x9b   : >> { %v1028_v25 = vunpack.i.h.bf16 %v1323_v40  ;;  %v1027_v26 = vunpack.i.l.bf16 %v1323_v40 }
  0x9c   : >> { %v381_v36 = vsel %vm380_vm6, %v376_v18, %v1032_v21 }
  0x9d   : >> { %v1325_v41 = vpop.permute.xlu1 %1040  ;;  %v378_v46 = vsel %vm375_vm5, %v373_v6, %v1027_v26  ;;  %v379_v45 = vsel %vm375_vm5, %v374_v7, %v1028_v25 }
  0x9e   : >> { %v1327_v42 = vpop.permute.xlu0 %1035  ;;  %v1043_v34 = vunpack.i.h.bf16 %v1325_v41  ;;  %v1042_v30 = vunpack.i.l.bf16 %v1325_v41  ;;  %v382_v41 = vsel %vm380_vm6, %v377_v19, %v1033_v24 }
  0x9f   : >> { %v1038_v32 = vunpack.i.h.bf16 %v1327_v42  ;;  %v1037_v35 = vunpack.i.l.bf16 %v1327_v42 }
  0xa0   : >> { %v617_v52 = vsel %vm380_vm6, %v613_v28, %v1042_v30  ;;  %v618_v53 = vsel %vm380_vm6, %v614_v29, %v1043_v34 }
  0xa1   : >> { %v1329_v43 = vpop.permute.xlu1 %1050  ;;  %v615_v55 = vsel %vm375_vm5, %v611_v33, %v1037_v35  ;;  %v616_v56 = vsel %vm375_vm5, %v612_v31, %v1038_v32 }
  0xa2   : >> { %v1331_v44 = vpop.permute.xlu0 %1045  ;;  %v1053_v37 = vunpack.i.h.bf16 %v1329_v43  ;;  %v1052_v38 = vunpack.i.l.bf16 %v1329_v43 }
  0xa3   : >> { %v1047_v39 = vunpack.i.l.bf16 %v1331_v44  ;;  %v1048_v51 = vunpack.i.h.bf16 %v1331_v44 }
  0xa4   : >> { %v386_v44 = vsel %vm385_vm7, %v381_v36, %v1052_v38  ;;  %v387_v59 = vsel %vm385_vm7, %v382_v41, %v1053_v37 }
  0xa5   : >> { %v1333_v47 = vpop.permute.xlu1 %1060  ;;  %v383_v60 = vsel %vm380_vm6, %v378_v46, %v1047_v39 }
  0xa6   : >> { %v1335_v48 = vpop.permute.xlu0 %1055  ;;  %v1063_v43 = vunpack.i.h.bf16 %v1333_v47  ;;  %v1062_v54 = vunpack.i.l.bf16 %v1333_v47  ;;  %v384_v47 = vsel %vm380_vm6, %v379_v45, %v1048_v51 }
  0xa7   : >> { %v1058_v57 = vunpack.i.h.bf16 %v1335_v48  ;;  %v1057_v58 = vunpack.i.l.bf16 %v1335_v48 }
  0xa8   : >> { %v621_v9 = vsel %vm385_vm7, %v617_v52, %v1062_v54  ;;  %v622_v10 = vsel %vm385_vm7, %v618_v53, %v1063_v43 }
  0xa9   : >> { %v1337_v49 = vpop.permute.xlu1 %1070  ;;  %v619_v16 = vsel %vm380_vm6, %v615_v55, %v1057_v58  ;;  %v620_v18 = vsel %vm380_vm6, %v616_v56, %v1058_v57 }
  0xaa   : >> { %v1339_v50 = vpop.permute.xlu0 %1065  ;;  %v1072_v61 = vunpack.i.l.bf16 %v1337_v49  ;;  %v1073_v6 = vunpack.i.h.bf16 %v1337_v49 }
  0xab   : >> { %v1068_v7 = vunpack.i.h.bf16 %v1339_v50  ;;  %v1067_v8 = vunpack.i.l.bf16 %v1339_v50 }
  0xac   : >> { %v391_v50 = vsel %vm390_vm8, %v386_v44, %v1072_v61 }
  0xad   : >> { %v1345_v62 = vpop.permute.xlu1 %1080  ;;  %v388_v25 = vsel %vm385_vm7, %v383_v60, %v1067_v8  ;;  %v389_v26 = vsel %vm385_vm7, %v384_v47, %v1068_v7 }
  0xae   : >> { %v1347_v2 = vpop.permute.xlu0 %1075  ;;  %v1083_v11 = vunpack.i.h.bf16 %v1345_v62  ;;  %v1082_v15 = vunpack.i.l.bf16 %v1345_v62  ;;  %v392_v62 = vsel %vm390_vm8, %v387_v59, %v1073_v6 }
  0xaf   : >> { %v1078_v49 = vunpack.i.h.bf16 %v1347_v2  ;;  %v1077_v19 = vunpack.i.l.bf16 %v1347_v2 }
  0xb0   : >> { %v625_v2 = vsel %vm390_vm8, %v621_v9, %v1082_v15  ;;  %v626_v34 = vsel %vm390_vm8, %v622_v10, %v1083_v11 }
  0xb1   : >> { %v1357_v22 = vpop.permute.xlu1 %1090  ;;  %v624_v33 = vsel %vm385_vm7, %v620_v18, %v1078_v49 }
  0xb2   : >> { %v1363_v27 = vpop.permute.xlu0 %1085  ;;  %v1093_v20 = vunpack.i.h.bf16 %v1357_v22  ;;  %v1092_v21 = vunpack.i.l.bf16 %v1357_v22  ;;  %v623_v22 = vsel %vm385_vm7, %v619_v16, %v1077_v19 }
  0xb3   : >> { %v1087_v23 = vunpack.i.l.bf16 %v1363_v27  ;;  %v1088_v28 = vunpack.i.h.bf16 %v1363_v27 }
  0xb4   : >> { %v396_v36 = vsel %vm395_vm9, %v391_v50, %v1092_v21  ;;  %v397_v37 = vsel %vm395_vm9, %v392_v62, %v1093_v20 }
  0xb5   : >> { %v1379_v40 = vpop.permute.xlu1 %1100  ;;  %v393_v27 = vsel %vm390_vm8, %v388_v25, %v1087_v23  ;;  %v394_v41 = vsel %vm390_vm8, %v389_v26, %v1088_v28 }
  0xb6   : >> { %v1385_v42 = vpop.permute.xlu0 %1095  ;;  %v1103_v32 = vunpack.i.h.bf16 %v1379_v40  ;;  %v1102_v35 = vunpack.i.l.bf16 %v1379_v40 }
  0xb7   : >> { %v1097_v38 = vunpack.i.l.bf16 %v1385_v42  ;;  %v1098_v46 = vunpack.i.h.bf16 %v1385_v42 }
  0xb8   : >> { %v629_v55 = vsel %vm395_vm9, %v625_v2, %v1102_v35  ;;  %v630_v56 = vsel %vm395_vm9, %v626_v34, %v1103_v32 }
  0xb9   : >> { %v1111_v63 = vpop.permute.xlu1 %1110  ;;  %v627_v44 = vsel %vm390_vm8, %v623_v22, %v1097_v38  ;;  %v628_v19 = vsel %vm390_vm8, %v624_v33, %v1098_v46  ;;  %v1180_v38 = vmov 0.0  }
  0xba   : >> { %v1403_v48 = vpop.permute.xlu0 %1105  ;;  %v1113_v30 = vunpack.i.h.bf16 %v1111_v63  ;;  %v1112_v31 = vunpack.i.l.bf16 %v1111_v63  ;;  %956 = vmatprep.subr.bf16.mxu0 %v1180_v38 }
  0xbb   : >> { %v1108_v42 = vunpack.i.h.bf16 %v1403_v48  ;;  %v1107_v59 = vunpack.i.l.bf16 %v1403_v48 }
  0xbc   : >> { %v401_v40 = vsel %vm400_vm10, %v396_v36, %v1112_v31  ;;  %v402_v54 = vsel %vm400_vm10, %v397_v37, %v1113_v30 }
  0xbd   : >> { %v1121_v24 = vpop.permute.xlu1 %1120  ;;  %v398_v50 = vsel %vm395_vm9, %v393_v27, %v1107_v59  ;;  %v399_v20 = vsel %vm395_vm9, %v394_v41, %v1108_v42 }
  0xbe   : >> { %v1116_v29 = vpop.permute.xlu0 %1115  ;;  %v1123_v53 = vunpack.i.h.bf16 %v1121_v24  ;;  %v1122_v43 = vunpack.i.l.bf16 %v1121_v24 }
  0xbf   : >> { %v1118_v63 = vunpack.i.h.bf16 %v1116_v29  ;;  %v1117_v47 = vunpack.i.l.bf16 %v1116_v29 }
  0xc0   : >> { %v633_v11 = vsel %vm400_vm10, %v629_v55, %v1122_v43  ;;  %v634_v15 = vsel %vm400_vm10, %v630_v56, %v1123_v53 }
  0xc1   : >> { %v1131_v39 = vpop.permute.xlu1 %1130  ;;  %v631_v24 = vsel %vm395_vm9, %v627_v44, %v1117_v47  ;;  %v632_v62 = vsel %vm395_vm9, %v628_v19, %v1118_v63 }
  0xc2   : >> { %v1133_v45 = vunpack.i.h.bf16 %v1131_v39  ;;  %v1132_v51 = vunpack.i.l.bf16 %v1131_v39  ;;  %v1126_v52 = vpop.permute.xlu0 %1125 }
  0xc3   : >> { %v1128_v16 = vunpack.i.h.bf16 %v1126_v52  ;;  %v1127_v18 = vunpack.i.l.bf16 %v1126_v52 }
  0xc4   : >> { %v406_v57 = vsel %vm405_vm11, %v401_v40, %v1132_v51  ;;  %v407_v58 = vsel %vm405_vm11, %v402_v54, %v1133_v45 }
  0xc5   : >> { %v1141_v60 = vpop.permute.xlu1 %1140  ;;  %v410_v61 = vpack.c.bf16 %v407_v58, %v406_v57  ;;  %v403_v31 = vsel %vm400_vm10, %v398_v50, %v1127_v18  ;;  %v404_v22 = vsel %vm400_vm10, %v399_v20, %v1128_v16 }
  0xc6   : >> { %v1143_v6 = vunpack.i.h.bf16 %v1141_v60  ;;  %v1142_v7 = vunpack.i.l.bf16 %v1141_v60  ;;  %v1136_v8 = vpop.permute.xlu0 %1135 }
  0xc7   : >> { %v1138_v9 = vunpack.i.h.bf16 %v1136_v8  ;;  %v1137_v10 = vunpack.i.l.bf16 %v1136_v8  ;;  %944 = vmatprep.mubr.msk.bf16.mxu0 %vm423_vm12, %v410_v61 }
  0xc8   : >> { %v637_v49 = vsel %vm405_vm11, %v633_v11, %v1142_v7  ;;  %v638_v48 = vsel %vm405_vm11, %v634_v15, %v1143_v6 }
  0xc9   : >> { %v1151_v21 = vpop.permute.xlu1 %1150  ;;  %v641_v23 = vpack.c.bf16 %v638_v48, %v637_v49  ;;  %v635_v29 = vsel %vm400_vm10, %v631_v24, %v1137_v10  ;;  %v636_v2 = vsel %vm400_vm10, %v632_v62, %v1138_v9 }
  0xca   : >> { %v1153_v25 = vunpack.i.h.bf16 %v1151_v21  ;;  %v1152_v26 = vunpack.i.l.bf16 %v1151_v21  ;;  %v1146_v28 = vpop.permute.xlu0 %1145 }
  0xcb   : >> { %v1148_v34 = vunpack.i.h.bf16 %v1146_v28  ;;  %v1147_v30 = vunpack.i.l.bf16 %v1146_v28  ;;  %952 = vmatprep.mubr.msk.bf16.mxu1 %vm423_vm12, %v641_v23 }
  0xcc   : >> { %v639_v33 = vsel %vm405_vm11, %v635_v29, %v1152_v26  ;;  %v640_v32 = vsel %vm405_vm11, %v636_v2, %v1153_v25 }
  0xcd   : >> { %v642_v35 = vpack.c.bf16 %v640_v32, %v639_v33  ;;  %v408_v36 = vsel %vm405_vm11, %v403_v31, %v1147_v30  ;;  %v409_v37 = vsel %vm405_vm11, %v404_v22, %v1148_v34 }
  0xce   : >> { %v411_v27 = vpack.c.bf16 %v409_v37, %v408_v36 }
  0xcf   : >> { %953 = vmatmul.mubr.msk.bf16.vlgmr.msra.gmra.mxu1 %vm423_vm12, %v642_v35 }
  0xd0   : >> { %945 = vmatmul.mubr.msk.bf16.vlgmr.msra.gmra.mxu0 %vm423_vm12, %v411_v27 }
  0xd1   : >> { %960 = vmatprep.mubr.msk.bf16.mxu0 %vm1181_vm13, %v1180_v38 }
 0x18f   : >> { %v954_v39 = vpop.f32.mrf.mxu1 }
 0x190   : >> { %v946_v41 = vpop.f32.mrf.mxu0 }
 0x191   : >> { %v683_v46 = vpop.f32.mrf.mxu1  ;;  %v700_v51 = vmax.f32 %v946_v41, %v954_v39 }
 0x192   : >> { %v471_v45 = vpop.f32.mrf.mxu0 }
 0x193   : >> { %v955_v52 = vpop.f32.mrf.mxu1  ;;  %v698_v43 = vmax.f32 %v471_v45, %v683_v46  ;;  %v710_v56 = vrot.slane %v700_v51, 1 }
 0x194   : >> { %v947_v53 = vpop.f32.mrf.mxu0 }
 0x195   : >> { %v701_v40 = vmax.f32 %v947_v53, %v955_v52  ;;  %v686_v54 = vpop.f32.mrf.mxu1  ;;  %v707_v44 = vrot.slane %v698_v43, 1 }
 0x196   : >> { %v474_v55 = vpop.f32.mrf.mxu0 }
 0x197   : >> { %v712_v57 = vrot.slane %v701_v40, 1  ;;  %v699_v58 = vmax.f32 %v474_v55, %v686_v54 }
 0x199   : >> { %v713_v42 = vsel %vm706_vm14, %v710_v56, %v712_v57  ;;  %v721_v59 = vmax.f32 %v701_v40, %v712_v57  ;;  %v708_v60 = vrot.slane %v699_v58, 1 }
 0x19a   : >> { %v720_v61 = vmax.f32 %v700_v51, %v713_v42 }
 0x19b   : >> { %v709_v63 = vsel %vm706_vm14, %v707_v44, %v708_v60  ;;  %v711_v47 = vsel %vm706_vm14, %v708_v60, %v710_v56 }
 0x19c   : >> { %v723_v6 = vpack.c.bf16 %v721_v59, %v720_v61  ;;  %v718_v8 = vmax.f32 %v698_v43, %v709_v63  ;;  %v719_v9 = vmax.f32 %v699_v58, %v711_v47 }
 0x19e   : >> { %v734_v7 = vand.u32 %v723_v6, %v1312_v17  ;;  %v722_v10 = vpack.c.bf16 %v719_v9, %v718_v8 }
 0x1a0   : >> { %957 = vmatpush3.bf16.msra.mxu0 %v734_v7 }
 0x1a1   : >> { %958 = vmatprep.subr.bf16.mxu0 %v1180_v38 }
 0x1a4   : >> { %959 = vmatpush3.bf16.msra.mxu0 %v722_v10 }
 0x1a7   : >> { %961 = vmatmul.mubr.msk.bf16.vlgmr.msra.gmra.mxu0 %vm423_vm12, %v190_v14 }
 0x267   : >> { %v770_v11 = vpop.f32.mrf.mxu0 }
 0x268   : >> { %v771_v15 = vadd.f32 %v1233_v5, %v770_v11 }
 0x269   : >> { %v962_v16 = vpop.f32.mrf.mxu0 }
 0x26a   : >> { %v777_v18 = vmax.f32 %v771_v15, 0.0 }
 0x26b   : >> { %v773_v17 = vpop.f32.mrf.mxu0 }
 0x26c   : >> { %782 = vst.msk [vmem:[%s780_s18] sm:$0xff] %vm781_vm15, %v777_v18  ;;  %v774_v49 = vadd.f32 %v1233_v5, %v773_v17  ;;  %195 = sbr.rel (!%p193_p4) target bundleno = 22 (0x16), region = 74 }
 0x26d   : >> { %v963_v48 = vpop.f32.mrf.mxu0 }
 0x26e   : >> { %v778_v19 = vmax.f32 %v774_v49, 0.0 }
 0x270   : >> { %784 = vst.msk [vmem:[%s780_s18 + $0x8] sm:$0x3f] %vm783_vm0, %v778_v19 }
 0x271 PF: > { %s13_s12 = sadd.s32 1, %s1164_s12  }
 0x272   : > { %p10_p5 = scmp.ge.s32.totalorder %s13_s12, 4  }
 0x274   :  { %12 = sbr.rel (!%p10_p5) target bundleno = 1 (0x1), region = 85 }

// kernel: neuralnet_forward.6
= control target key start
LH: loop header
LB: loop body
LE: loop exit
PB: predicated region body
PF: predicated region fallthrough
CT: control target
= control target key end

     0   :  { %s888_s12 = smov 0   ;;  %s1124_s0 = inlined_call_operand.vmem [shape: f32[2,14,14,16], index: 0, kind: input, shape index: {}]   ;;  %s1125_s1 = inlined_call_operand.vmem [shape: bf16[144,32], index: 1, kind: input, shape index: {}]   ;;  %s1126_s2 = inlined_call_operand.vmem [shape: f32[1,32], index: 2, kind: input, shape index: {}]   ;;  %s1127_s3 = inlined_call_operand.vmem [shape: f32[2,6,6,32], index: 3, kind: output, shape index: {}]  }
   0x1 LB: > { %s678_s13 = sadd.s32 4294967295, %s850_s12   ;;  %p682_p0 = scmp.ge.s32.totalorder %s850_s12, 1  ;;  %s850_s12 = sphi %s888_s12, %s13_s12  }
   0x2   : > { %p137_p1 = scmp.lt.s32.totalorder %s850_s12, 3 }
   0x4   : > { %p138_p2 = pnand %p682_p0, %p137_p1 }
   0x5   : > { %p161_p3 = scmp.lt.s32.totalorder (!%p138_p2), %s678_s13, 1 }
   0x6   : > { %141 = sbr.rel (%p138_p2) target bundleno = 582 (0x246), region = 32 }
   0xb   : > { %v899_v0 = vld [vmem:[%s1125_s1] sm:$0xf]  ;;  %v904_v1 = vld [vmem:[%s1125_s1 + $0x4] sm:$0xf]  ;;  %v191_v2 = vlaneseq  ;;  %v909_v3 = vld [vmem:[%s1125_s1 + $0x8] sm:$0xf] }
   0xc   : > { %v914_v4 = vld [vmem:[%s1125_s1 + $0xc] sm:$0xf]  ;;  %v919_v5 = vld [vmem:[%s1125_s1 + $0x10] sm:$0xf]  ;;  %s1129_s13 = smov (!%p161_p3, %s678_s13), 1  ;;  %v856_v23 = vmov 0.0  }
   0xd   : > { %v924_v6 = vld [vmem:[%s1125_s1 + $0x14] sm:$0xf]  ;;  %v929_v7 = vld [vmem:[%s1125_s1 + $0x18] sm:$0xf]  ;;  %v192_v8 = vshrl.u32 %v191_v2, 7  ;;  %s740_s7 = smul.u32 224, %s1129_s13 }
   0xe   : > { %v934_v9 = vld [vmem:[%s1125_s1 + $0x1c] sm:$0xf]  ;;  %v939_v10 = vld [vmem:[%s1125_s1 + $0x20] sm:$0xf]  ;;  %v944_v11 = vld [vmem:[%s1125_s1 + $0x24] sm:$0xf] }
   0xf   : > { %v949_v12 = vld [vmem:[%s1125_s1 + $0x28] sm:$0xf]  ;;  %v954_v13 = vld [vmem:[%s1125_s1 + $0x2c] sm:$0xf]  ;;  %v194_v14 = vand.u32 127, %v191_v2  ;;  %s741_s14 = smul.u32 48, %s1129_s13  ;;  %s969_s21 = scalar_lea.vmem %s1124_s0, %s740_s7 }
  0x10   : > { %v959_v15 = vld [vmem:[%s1125_s1 + $0x30] sm:$0xf]  ;;  %v964_v16 = vld [vmem:[%s1125_s1 + $0x34] sm:$0xf]  ;;  %v195_v17 = vmul.u32 2, %v192_v8  ;;  %s1005_s7 = smov 0  }
  0x11   : > { %v974_v18 = vld [vmem:[%s1125_s1 + $0x38] sm:$0xf]  ;;  %v979_v19 = vld [vmem:[%s1125_s1 + $0x3c] sm:$0xf]  ;;  %v984_v20 = vld [vmem:[%s1125_s1 + $0x40] sm:$0xf]  ;;  %s989_s29 = scalar_lea.vmem %s1127_s3, %s741_s14 }
  0x12   : > { %v994_v21 = vld [vmem:[%s1125_s1 + $0x44] sm:$0xf]  ;;  %v999_v22 = vld [vmem:[%s1126_s2] ss:$0 sm:$0xff]  ;;  %vm196_vm0 = vcmp.eq.s32.totalorder %v194_v14, %v195_v17 }
  0x13   : > { %v1001_v24 = vsel %vm196_vm0, 1.0, %v856_v23 }
  0x14   : > { %v199_v25 = vpack.c.bf16 %v1001_v24, %v1001_v24 }
  0x15 LB: >> { %v711_v26 = vcombine.low %v974_v18, %v979_v19  ;;  %v857_v27 = vmov 0   ;;  %s728_s8 = sshll.u32 %s854_s7, 5  ;;  %v710_v28 = vcombine.low %v959_v15, %v964_v16  ;;  %v709_v39 = vcombine.low %v949_v12, %v954_v13  ;;  %s858_s10 = smov 32   ;;  %s854_s7 = sphi %s1005_s7, %s205_s7  }
  0x16   : >> { %369 = vmatprep.subr.bf16.mxu0 %v857_v27  ;;  %486 = vmatprep.subr.bf16.mxu1 %v857_v27  ;;  %s1018_s9 = scalar_lea.vmem %s969_s21, %s728_s8  ;;  %s859_s11 = smov 16   ;;  %v708_v46 = vcombine.low %v939_v10, %v944_v11  ;;  %v707_v51 = vcombine.low %v929_v7, %v934_v9  ;;  %v706_v55 = vcombine.low %v919_v5, %v924_v6  ;;  %vm289_vm1 = vcmask 130048  }
  0x17   : >> { %370 = vmatpush1.bf16.msra.mxu0 %v711_v26  ;;  %487 = vmatpush1.bf16.msra.mxu1 %v711_v26  ;;  %v213_v29 = vld [vmem:[%s1018_s9 + $0x2] sm:$0xff]  ;;  %v214_v30 = vld [vmem:[%s1018_s9 + $0xa] sm:$0xf]  ;;  %v694_v34 = vld [vmem:[%s1018_s9 + $0x12] sm:$0xff]  ;;  %s860_s14 = smov 48   ;;  %s861_s15 = smov 64   ;;  %v705_v63 = vcombine.low %v909_v3, %v914_v4  ;;  %v704_v17 = vcombine.low %v899_v0, %v904_v1  ;;  %v712_v26 = vcombine.low %v984_v20, %v994_v21 }
  0x18   : >> { %371 = vmatprep.subr.bf16.mxu0 %v857_v27  ;;  %488 = vmatprep.subr.bf16.mxu1 %v857_v27  ;;  %v211_v31 = vld [vmem:[%s1018_s9 + $0x1] sm:$0xff]  ;;  %v780_v32 = vpack.i.bf16 %v214_v30, %v213_v29  ;;  %v212_v33 = vld [vmem:[%s1018_s9 + $0x9] sm:$0xf]  ;;  %v695_v35 = vld [vmem:[%s1018_s9 + $0x1a] sm:$0xf]  ;;  %s862_s16 = smov 80  }
  0x19   : >> { %v770_v36 = vpack.i.bf16 %v212_v33, %v211_v31  ;;  %v692_v37 = vld [vmem:[%s1018_s9 + $0x11] sm:$0xff]  ;;  %v693_v38 = vld [vmem:[%s1018_s9 + $0x19] sm:$0xf]  ;;  %v785_v40 = vpack.i.bf16 %v695_v35, %v694_v34  ;;  %v698_v42 = vld [vmem:[%s1018_s9 + $0x20] sm:$0xff]  ;;  %s863_s17 = smov 96   ;;  %s864_s18 = smov 112  }
  0x1a   : >> { %781 = vrot.lane.b32.xlu1 %v780_v32, %s858_s10  ;;  %v775_v41 = vpack.i.bf16 %v693_v38, %v692_v37  ;;  %v699_v43 = vld [vmem:[%s1018_s9 + $0x28] sm:$0xf]  ;;  %v1037_v44 = vld [vmem:[%s1018_s9 + $0x10] sm:$0xff]  ;;  %v1040_v45 = vld [vmem:[%s1018_s9 + $0x18] sm:$0xf]  ;;  %vm292_vm2 = vcmask 261120  }
  0x1b   : >> { %372 = vmatpush1.bf16.msra.mxu0 %v710_v28  ;;  %489 = vmatpush1.bf16.msra.mxu1 %v710_v28  ;;  %v795_v47 = vpack.i.bf16 %v699_v43, %v698_v42  ;;  %v790_v48 = vpack.i.bf16 %v1040_v45, %v1037_v44  ;;  %v700_v49 = vld [vmem:[%s1018_s9 + $0x21] sm:$0xff]  ;;  %v701_v50 = vld [vmem:[%s1018_s9 + $0x29] sm:$0xf]  ;;  %v720_v58 = vld [vmem:[%s1018_s9 + $0x32] sm:$0xff]  ;;  %vm295_vm3 = vcmask 392192   ;;  %vm298_vm4 = vcmask 523264  }
  0x1c   : >> { %373 = vmatprep.subr.bf16.mxu0 %v857_v27  ;;  %771 = vrot.lane.b32.xlu0 %v770_v36, %s859_s11  ;;  %v805_v52 = vpack.i.bf16 %v701_v50, %v700_v49  ;;  %v702_v53 = vld [vmem:[%s1018_s9 + $0x22] sm:$0xff]  ;;  %v703_v54 = vld [vmem:[%s1018_s9 + $0x2a] sm:$0xf]  ;;  %v721_v59 = vld [vmem:[%s1018_s9 + $0x3a] sm:$0xf]  ;;  %vm301_vm5 = vcmask 654336  }
  0x1d   : >> { %490 = vmatprep.subr.bf16.mxu1 %v857_v27  ;;  %v815_v56 = vpack.i.bf16 %v703_v54, %v702_v53  ;;  %v311_v57 = vpack.c.bf16 %v703_v54, %v702_v53  ;;  %v716_v60 = vld [vmem:[%s1018_s9 + $0x30] sm:$0xff]  ;;  %v717_v61 = vld [vmem:[%s1018_s9 + $0x38] sm:$0xf]  ;;  %v482_v62 = vpack.c.bf16 %v721_v59, %v720_v58  ;;  %v209_v36 = vld [vmem:[%s1018_s9] sm:$0xff]  ;;  %vm304_vm6 = vcmask 785408   ;;  %s725_s19 = sshll.u32 %s854_s7, 3 }
  0x1e   : >> { %786 = vrot.lane.b32.xlu1 %v785_v40, %s858_s10  ;;  %v825_v2 = vpack.i.bf16 %v717_v61, %v716_v60  ;;  %v718_v8 = vld [vmem:[%s1018_s9 + $0x31] sm:$0xff]  ;;  %v719_v14 = vld [vmem:[%s1018_s9 + $0x39] sm:$0xf]  ;;  %v210_v37 = vld [vmem:[%s1018_s9 + $0x8] sm:$0xf]  ;;  %vm307_vm7 = vcmask 916480   ;;  %s599_s20 = scalar_lea.vmem %s989_s29, %s725_s19 }
  0x1f   : >> { %374 = vmatpush1.bf16.msra.mxu0 %v709_v39  ;;  %491 = vmatpush1.bf16.msra.mxu1 %v709_v39  ;;  %v835_v23 = vpack.i.bf16 %v719_v14, %v718_v8  ;;  %vm866_vm8 = vmmov 0   ;;  %vm550_vm9 = vcmask 1044480   ;;  %vm531_vm10 = vcmask 1046528   ;;  %s205_s7 = sadd.s32 1, %s854_s7  }
  0x20   : >> { %375 = vmatprep.subr.bf16.mxu0 %v857_v27  ;;  %776 = vrot.lane.b32.xlu0 %v775_v41, %s859_s11  ;;  %vm551_vm11 = vcmask 1045504   ;;  %vm546_vm12 = vcmask 89088   ;;  %vm600_vm13 = vcmask 259072   ;;  %p202_p4 = scmp.ge.s32.totalorder %s205_s7, 6  }
  0x21   : >> { %492 = vmatprep.subr.bf16.mxu1 %v857_v27  ;;  %713 = vmatprep.mubr.msk.bf16.mxu0 %vm289_vm1, %v311_v57 }
  0x22   : >> { %796 = vrot.lane.b32.xlu1 %v795_v47, %s860_s14  ;;  %722 = vmatprep.mubr.msk.bf16.mxu1 %vm289_vm1, %v482_v62 }
  0x23   : >> { %376 = vmatpush1.bf16.msra.mxu0 %v708_v46  ;;  %493 = vmatpush1.bf16.msra.mxu1 %v708_v46 }
  0x24   : >> { %377 = vmatprep.subr.bf16.mxu0 %v857_v27  ;;  %791 = vrot.lane.b32.xlu0 %v790_v48, %s860_s14 }
  0x25   : >> { %494 = vmatprep.subr.bf16.mxu1 %v857_v27 }
  0x26   : >> { %806 = vrot.lane.b32.xlu1 %v805_v52, %s861_s15 }
  0x27   : >> { %378 = vmatpush1.bf16.msra.mxu0 %v707_v51  ;;  %495 = vmatpush1.bf16.msra.mxu1 %v707_v51 }
  0x28   : >> { %379 = vmatprep.subr.bf16.mxu0 %v857_v27  ;;  %801 = vrot.lane.b32.xlu0 %v775_v41, %s861_s15 }
  0x29   : >> { %496 = vmatprep.subr.bf16.mxu1 %v857_v27 }
  0x2a   : >> { %816 = vrot.lane.b32.xlu1 %v815_v56, %s862_s16 }
  0x2b   : >> { %380 = vmatpush1.bf16.msra.mxu0 %v706_v55  ;;  %497 = vmatpush1.bf16.msra.mxu1 %v706_v55 }
  0x2c   : >> { %381 = vmatprep.subr.bf16.mxu0 %v857_v27  ;;  %811 = vrot.lane.b32.xlu0 %v785_v40, %s862_s16 }
  0x2d   : >> { %498 = vmatprep.subr.bf16.mxu1 %v857_v27 }
  0x2e   : >> { %826 = vrot.lane.b32.xlu1 %v825_v2, %s863_s17 }
  0x2f   : >> { %382 = vmatpush1.bf16.msra.mxu0 %v705_v63  ;;  %499 = vmatpush1.bf16.msra.mxu1 %v705_v63 }
  0x30   : >> { %383 = vmatprep.subr.bf16.mxu0 %v857_v27  ;;  %821 = vrot.lane.b32.xlu0 %v795_v47, %s863_s17 }
  0x31   : >> { %500 = vmatprep.subr.bf16.mxu1 %v857_v27 }
  0x32   : >> { %836 = vrot.lane.b32.xlu1 %v835_v23, %s864_s18 }
  0x33   : >> { %384 = vmatpush1.bf16.msra.mxu0 %v704_v17  ;;  %501 = vmatpush1.bf16.msra.mxu1 %v704_v17 }
  0x34   : >> { %399 = vmatprep.subr.bf16.mxu0 %v857_v27  ;;  %831 = vrot.lane.b32.xlu0 %v805_v52, %s864_s18 }
  0x35   : >> { %516 = vmatprep.subr.bf16.mxu1 %v857_v27 }
  0x37   : >> { %400 = vmatpush2.bf16.msra.mxu0 %v712_v26  ;;  %517 = vmatpush2.bf16.msra.mxu1 %v712_v26 }
  0x8c   : >> { %v782_v28 = vpop.permute.xlu1 %781 }
  0x8d   : >> { %v784_v42 = vunpack.i.h.bf16 %v782_v28  ;;  %v783_v43 = vunpack.i.l.bf16 %v782_v28 }
  0x8e   : >> { %v772_v29 = vpop.permute.xlu0 %771 }
  0x8f   : >> { %v774_v34 = vunpack.i.h.bf16 %v772_v29  ;;  %v773_v35 = vunpack.i.l.bf16 %v772_v29 }
  0x90   : >> { %v787_v30 = vpop.permute.xlu1 %786 }
  0x91   : >> { %v290_v27 = vsel %vm289_vm1, %v209_v36, %v773_v35  ;;  %v291_v46 = vsel %vm289_vm1, %v210_v37, %v774_v34  ;;  %v789_v47 = vunpack.i.h.bf16 %v787_v30  ;;  %v788_v48 = vunpack.i.l.bf16 %v787_v30 }
  0x92   : >> { %v777_v31 = vpop.permute.xlu0 %776  ;;  %v293_v57 = vsel %vm292_vm2, %v290_v27, %v783_v43  ;;  %v294_v58 = vsel %vm292_vm2, %v291_v46, %v784_v42 }
  0x93   : >> { %v779_v38 = vunpack.i.h.bf16 %v777_v31  ;;  %v778_v39 = vunpack.i.l.bf16 %v777_v31 }
  0x94   : >> { %v797_v32 = vpop.permute.xlu1 %796 }
  0x95   : >> { %v468_v49 = vsel %vm289_vm1, %v1040_v45, %v779_v38  ;;  %v467_v50 = vsel %vm289_vm1, %v1037_v44, %v778_v39  ;;  %v799_v52 = vunpack.i.h.bf16 %v797_v32  ;;  %v798_v53 = vunpack.i.l.bf16 %v797_v32 }
  0x96   : >> { %v792_v33 = vpop.permute.xlu0 %791  ;;  %v469_v59 = vsel %vm292_vm2, %v467_v50, %v788_v48  ;;  %v470_v45 = vsel %vm292_vm2, %v468_v49, %v789_v47 }
  0x97   : >> { %v794_v55 = vunpack.i.h.bf16 %v792_v33  ;;  %v793_v56 = vunpack.i.l.bf16 %v792_v33  ;;  %v471_v14 = vsel %vm295_vm3, %v469_v59, %v798_v53  ;;  %v472_v17 = vsel %vm295_vm3, %v470_v45, %v799_v52 }
  0x98   : >> { %v807_v40 = vpop.permute.xlu1 %806  ;;  %v865_v45 = vmov 0.0  }
  0x99   : >> { %v809_v60 = vunpack.i.h.bf16 %v807_v40  ;;  %v808_v44 = vunpack.i.l.bf16 %v807_v40  ;;  %v296_v29 = vsel %vm295_vm3, %v293_v57, %v793_v56  ;;  %v297_v30 = vsel %vm295_vm3, %v294_v58, %v794_v55  ;;  %734 = vmatprep.subr.bf16.mxu0 %v865_v45 }
  0x9a   : >> { %v802_v41 = vpop.permute.xlu0 %801 }
  0x9b   : >> { %v804_v61 = vunpack.i.h.bf16 %v802_v41  ;;  %v803_v62 = vunpack.i.l.bf16 %v802_v41  ;;  %v473_v33 = vsel %vm298_vm4, %v471_v14, %v808_v44  ;;  %v474_v34 = vsel %vm298_vm4, %v472_v17, %v809_v60 }
  0x9c   : >> { %v817_v51 = vpop.permute.xlu1 %816 }
  0x9d   : >> { %v819_v63 = vunpack.i.h.bf16 %v817_v51  ;;  %v818_v2 = vunpack.i.l.bf16 %v817_v51  ;;  %v299_v37 = vsel %vm298_vm4, %v296_v29, %v803_v62  ;;  %v300_v38 = vsel %vm298_vm4, %v297_v30, %v804_v61 }
  0x9e   : >> { %v812_v54 = vpop.permute.xlu0 %811  ;;  %v867_v29 = vmov 65535  }
  0x9f   : >> { %v814_v23 = vunpack.i.h.bf16 %v812_v54  ;;  %v813_v26 = vunpack.i.l.bf16 %v812_v54  ;;  %v475_v39 = vsel %vm301_vm5, %v473_v33, %v818_v2  ;;  %v476_v40 = vsel %vm301_vm5, %v474_v34, %v819_v63 }
  0xa0   : >> { %v827_v8 = vpop.permute.xlu1 %826  ;;  %v552_v30 = vsel %vm550_vm9, 4294967295, %v867_v29 }
  0xa1   : >> { %v829_v31 = vunpack.i.h.bf16 %v827_v8  ;;  %v828_v32 = vunpack.i.l.bf16 %v827_v8  ;;  %v302_v42 = vsel %vm301_vm5, %v299_v37, %v813_v26  ;;  %v303_v43 = vsel %vm301_vm5, %v300_v38, %v814_v23 }
  0xa2   : >> { %v822_v28 = vpop.permute.xlu0 %821  ;;  %v553_v34 = vsel %vm551_vm11, %v552_v30, 0 }
  0xa3   : >> { %v824_v35 = vunpack.i.h.bf16 %v822_v28  ;;  %v823_v36 = vunpack.i.l.bf16 %v822_v28  ;;  %v477_v48 = vsel %vm304_vm6, %v475_v39, %v828_v32  ;;  %v478_v49 = vsel %vm304_vm6, %v476_v40, %v829_v31 }
  0xa4   : >> { %v837_v41 = vpop.permute.xlu1 %836 }
  0xa5   : >> { %v839_v27 = vunpack.i.h.bf16 %v837_v41  ;;  %v838_v46 = vunpack.i.l.bf16 %v837_v41  ;;  %v305_v52 = vsel %vm304_vm6, %v302_v42, %v823_v36  ;;  %v306_v53 = vsel %vm304_vm6, %v303_v43, %v824_v35 }
  0xa6   : >> { %v832_v47 = vpop.permute.xlu0 %831 }
  0xa7   : >> { %v834_v50 = vunpack.i.h.bf16 %v832_v47  ;;  %v833_v51 = vunpack.i.l.bf16 %v832_v47  ;;  %v479_v54 = vsel %vm307_vm7, %v477_v48, %v838_v46  ;;  %v480_v55 = vsel %vm307_vm7, %v478_v49, %v839_v27 }
  0xa8   : >> { %v481_v58 = vpack.c.bf16 %v480_v55, %v479_v54 }
  0xa9   : >> { %v308_v56 = vsel %vm307_vm7, %v305_v52, %v833_v51  ;;  %v309_v57 = vsel %vm307_vm7, %v306_v53, %v834_v50 }
  0xaa   : >> { %v310_v59 = vpack.c.bf16 %v309_v57, %v308_v56  ;;  %519 = vmatmul.mubr.bf16.vlgmr.msra.gmra.mxu1 %v481_v58 }
  0xac   : >> { %402 = vmatmul.mubr.bf16.vlgmr.msra.gmra.mxu0 %v310_v59 }
  0xad   : >> { %736 = vmatprep.mubr.msk.bf16.mxu0 %vm866_vm8, %v865_v45 }
 0x16a   : >> { %v520_v60 = vpop.f32.mrf.mxu1 }
 0x16c   : >> { %v403_v44 = vpop.f32.mrf.mxu0  ;;  %v522_v61 = vpop.f32.mrf.mxu1 }
 0x16d   : >> { %v527_v63 = vmax.f32 %v403_v44, %v520_v60 }
 0x16e   : >> { %v405_v62 = vpop.f32.mrf.mxu0  ;;  %v523_v2 = vpop.f32.mrf.mxu1 }
 0x16f   : >> { %v532_v26 = vrot.slane %v527_v63, 1 }
 0x170   : >> { %v406_v8 = vpop.f32.mrf.mxu0  ;;  %v525_v17 = vpop.f32.mrf.mxu1 }
 0x171   : >> { %v528_v14 = vmax.f32 %v406_v8, %v523_v2 }
 0x172   : >> { %v408_v23 = vpop.f32.mrf.mxu0 }
 0x173   : >> { %v533_v28 = vrot.slane %v528_v14, 1 }
 0x175   : >> { %v534_v31 = vsel %vm531_vm10, %v532_v26, %v533_v28  ;;  %v538_v32 = vmax.f32 %v528_v14, %v533_v28 }
 0x176   : >> { %v537_v33 = vmax.f32 %v527_v63, %v534_v31 }
 0x178   : >> { %v539_v35 = vpack.c.bf16 %v538_v32, %v537_v33 }
 0x17a   : >> { %v555_v36 = vand.u32 %v553_v34, %v539_v35 }
 0x17c   : >> { %735 = vmatpush3.bf16.msra.mxu0 %v555_v36 }
 0x17f   : >> { %737 = vmatmul.mubr.msk.bf16.vlgmr.msra.gmra.mxu0 %vm546_vm12, %v199_v25 }
 0x23f   : >> { %v591_v37 = vpop.f32.mrf.mxu0 }
 0x240   : >> { %v592_v38 = vadd.f32 %v999_v22, %v591_v37 }
 0x241   : >> { %v738_v39 = vpop.f32.mrf.mxu0  ;;  %204 = sbr.rel (!%p202_p4) target bundleno = 21 (0x15), region = 74 }
 0x242   : >> { %v597_v40 = vmax.f32 %v592_v38, 0.0 }
 0x243   : >> { %v594_v41 = vpop.f32.mrf.mxu0 }
 0x244   : >> { %601 = vst.msk [vmem:[%s599_s20] sm:$0x3f] %vm600_vm13, %v597_v40 }
 0x245   : >> { %v739_v42 = vpop.f32.mrf.mxu0 }
 0x246 PF: > { %s13_s12 = sadd.s32 1, %s850_s12  }
 0x247   : > { %p10_p5 = scmp.ge.s32.totalorder %s13_s12, 4  }
 0x249   :  { %12 = sbr.rel (!%p10_p5) target bundleno = 1 (0x1), region = 85 }

// kernel: neuralnet_forward.8
= control target key start
LH: loop header
LB: loop body
LE: loop exit
PB: predicated region body
PF: predicated region fallthrough
CT: control target
= control target key end

     0   :  { %vm19_vm0 = vcmask 523264   ;;  %v198_v0 = vmov 0.0   ;;  %vm199_vm1 = vmmov 0   ;;  %vm144_vm2 = vcmask 519168   ;;  %s255_s1 = inlined_call_operand.vmem [shape: bf16[128,64], index: 1, kind: input, shape index: {}]   ;;  %s256_s0 = inlined_call_operand.vmem [shape: bf16[8,128], index: 0, kind: input, shape index: {}]   ;;  %s257_s2 = inlined_call_operand.vmem [shape: f32[1,64], index: 2, kind: input, shape index: {}]   ;;  %s258_s3 = inlined_call_operand.vmem [shape: bf16[8,64], index: 3, kind: output, shape index: {}]  }
   0x1   :  { %168 = vmatprep.subr.bf16.mxu0 %v198_v0  ;;  %v190_v1 = vld [vmem:[%s255_s1 + $0x38] sm:$0xff]   ;;  %184 = vmatprep.mubr.msk.bf16.mxu0 %vm199_vm1, %v198_v0  ;;  %20 = vst.msk [vmem:[#allocation2] sm:$0xff] %vm19_vm0, %v198_v0  ;;  %v191_v2 = vld [vmem:[%s255_s1 + $0x30] sm:$0xff]   ;;  %v192_v3 = vld [vmem:[%s255_s1 + $0x28] sm:$0xff]  }
   0x2   :  { %169 = vmatpush3.bf16.msra.mxu0 %v190_v1  ;;  %v193_v4 = vld [vmem:[%s255_s1 + $0x20] sm:$0xff]   ;;  %v194_v5 = vld [vmem:[%s255_s1 + $0x18] sm:$0xff]   ;;  %v195_v6 = vld [vmem:[%s255_s1 + $0x10] sm:$0xff]  }
   0x3   :  { %170 = vmatprep.subr.bf16.mxu0 %v198_v0  ;;  %v196_v7 = vld [vmem:[%s255_s1 + $0x8] sm:$0xff]   ;;  %v197_v8 = vld [vmem:[%s255_s1] sm:$0xff]  }
   0x4   :  { %v22_v9 = vld [vmem:[%s256_s0] sm:$0xf] }
   0x5   :  { %v158_v16 = vld [vmem:[%s257_s2] ss:$0 sm:$0xff] }
   0x6   :  { %171 = vmatpush3.bf16.msra.mxu0 %v191_v2 }
   0x7   :  { %172 = vmatprep.subr.bf16.mxu0 %v198_v0 }
   0x8   :  { %v21_v10 = vld [vmem:[#allocation2] sm:$0xff] }
   0xa   :  { %173 = vmatpush3.bf16.msra.mxu0 %v192_v3 }
   0xb   :  { %174 = vmatprep.subr.bf16.mxu0 %v198_v0 }
   0xe   :  { %175 = vmatpush3.bf16.msra.mxu0 %v193_v4 }
   0xf   :  { %176 = vmatprep.subr.bf16.mxu0 %v198_v0 }
  0x12   :  { %177 = vmatpush3.bf16.msra.mxu0 %v194_v5 }
  0x13   :  { %178 = vmatprep.subr.bf16.mxu0 %v198_v0 }
  0x16   :  { %179 = vmatpush3.bf16.msra.mxu0 %v195_v6 }
  0x17   :  { %180 = vmatprep.subr.bf16.mxu0 %v198_v0 }
  0x1a   :  { %181 = vmatpush3.bf16.msra.mxu0 %v196_v7 }
  0x1b   :  { %182 = vmatprep.subr.bf16.mxu0 %v198_v0 }
  0x1e   :  { %183 = vmatpush3.bf16.msra.mxu0 %v197_v8 }
  0x21   :  { %185 = vmatmul.mubr.bf16.vlgmr.msra.gmra.mxu0 %v22_v9 }
  0xe1   :  { %v121_v11 = vpop.f32.mrf.mxu0 }
  0xe2   :  { %v127_v12 = vadd.f32 %v121_v11, %v21_v10 }
  0xe3   :  { %v186_v13 = vpop.f32.mrf.mxu0 }
  0xe4   :  { %129 = vst.msk [vmem:[#allocation2] sm:$0xff] %vm19_vm0, %v127_v12 }
  0xe5   :  { %v124_v14 = vpop.f32.mrf.mxu0 }
  0xe7   :  { %v187_v15 = vpop.f32.mrf.mxu0 }
  0xeb   :  { %v133_v17 = vld [vmem:[#allocation2] sm:$0xff] }
  0xec   :  { %v141_v18 = vadd.f32 %v158_v16, %v133_v17 }
  0xee   :  { %v142_v19 = vmax.f32 %v141_v18, 0.0 }
  0xf0   :  { %v143_v20 = vpack.c.bf16 %v142_v19, %v142_v19 }
  0xf2   :  { %145 = vst.msk [vmem:[%s258_s3] sm:$0xf] %vm144_vm2, %v143_v20 }

// kernel: neuralnet_forward.7
= control target key start
LH: loop header
LB: loop body
LE: loop exit
PB: predicated region body
PF: predicated region fallthrough
CT: control target
= control target key end

     0   :  { %vm1138_vm0 = vmmov 0   ;;  %s1396_s1 = inlined_call_operand.vmem [shape: bf16[1152,128], index: 1, kind: input, shape index: {}]   ;;  %s1397_s0 = inlined_call_operand.vmem [shape: bf16[8,1152], index: 0, kind: input, shape index: {}]   ;;  %s1398_s2 = inlined_call_operand.vmem [shape: f32[1,128], index: 2, kind: input, shape index: {}]   ;;  %s1399_s3 = inlined_call_operand.vmem [shape: bf16[8,128], index: 3, kind: output, shape index: {}]  }
   0x1   :  { %v1056_v0 = vld [vmem:[%s1396_s1 + $0x78] sm:$0xff]   ;;  %v1060_v4 = vld [vmem:[%s1396_s1 + $0x70] sm:$0xff]   ;;  %v1064_v8 = vld [vmem:[%s1396_s1 + $0x68] sm:$0xff]  }
   0x2   :  { %v1057_v1 = vld [vmem:[%s1396_s1 + $0xf8] sm:$0xff]   ;;  %937 = vmatprep.subr.bf16.mxu0 %v1056_v0  ;;  %v1061_v5 = vld [vmem:[%s1396_s1 + $0xf0] sm:$0xff]   ;;  %v1065_v9 = vld [vmem:[%s1396_s1 + $0xe8] sm:$0xff]  }
   0x3   :  { %v1058_v2 = vld [vmem:[%s1396_s1 + $0x38] sm:$0xff]   ;;  %959 = vmatprep.subr.bf16.mxu1 %v1057_v1  ;;  %v1062_v6 = vld [vmem:[%s1396_s1 + $0x30] sm:$0xff]   ;;  %v1066_v10 = vld [vmem:[%s1396_s1 + $0x28] sm:$0xff]  }
   0x4   :  { %v1059_v3 = vld [vmem:[%s1396_s1 + $0xb8] sm:$0xff]   ;;  %938 = vmatpush3.bf16.msra.mxu0 %v1058_v2  ;;  %v1063_v7 = vld [vmem:[%s1396_s1 + $0xb0] sm:$0xff]   ;;  %v1067_v11 = vld [vmem:[%s1396_s1 + $0xa8] sm:$0xff]  }
   0x5   :  { %960 = vmatpush3.bf16.msra.mxu1 %v1059_v3  ;;  %939 = vmatprep.subr.bf16.mxu0 %v1060_v4  ;;  %v1068_v12 = vld [vmem:[%s1396_s1 + $0x60] sm:$0xff]   ;;  %v1072_v16 = vld [vmem:[%s1396_s1 + $0x58] sm:$0xff]   ;;  %v1076_v20 = vld [vmem:[%s1396_s1 + $0x50] sm:$0xff]  }
   0x6   :  { %961 = vmatprep.subr.bf16.mxu1 %v1061_v5  ;;  %v1069_v13 = vld [vmem:[%s1396_s1 + $0xe0] sm:$0xff]   ;;  %v1073_v17 = vld [vmem:[%s1396_s1 + $0xd8] sm:$0xff]   ;;  %v1077_v21 = vld [vmem:[%s1396_s1 + $0xd0] sm:$0xff]  }
   0x7   :  { %v1070_v14 = vld [vmem:[%s1396_s1 + $0x20] sm:$0xff]   ;;  %v1074_v18 = vld [vmem:[%s1396_s1 + $0x18] sm:$0xff]   ;;  %v1078_v22 = vld [vmem:[%s1396_s1 + $0x10] sm:$0xff]  }
   0x8   :  { %940 = vmatpush3.bf16.msra.mxu0 %v1062_v6  ;;  %v1071_v15 = vld [vmem:[%s1396_s1 + $0xa0] sm:$0xff]   ;;  %v1075_v19 = vld [vmem:[%s1396_s1 + $0x98] sm:$0xff]   ;;  %v1079_v23 = vld [vmem:[%s1396_s1 + $0x90] sm:$0xff]  }
   0x9   :  { %962 = vmatpush3.bf16.msra.mxu1 %v1063_v7  ;;  %941 = vmatprep.subr.bf16.mxu0 %v1064_v8  ;;  %v1080_v24 = vld [vmem:[%s1396_s1 + $0x48] sm:$0xff]   ;;  %v1084_v28 = vld [vmem:[%s1396_s1 + $0x40] sm:$0xff]   ;;  %v1092_v38 = vld [vmem:[%s1396_s1 + $0x178] sm:$0xff]  }
   0xa   :  { %963 = vmatprep.subr.bf16.mxu1 %v1065_v9  ;;  %v1081_v25 = vld [vmem:[%s1396_s1 + $0xc8] sm:$0xff]   ;;  %v1085_v29 = vld [vmem:[%s1396_s1 + $0xc0] sm:$0xff]   ;;  %v1093_v39 = vld [vmem:[%s1396_s1 + $0x138] sm:$0xff]  }
   0xb   :  { %v1082_v26 = vld [vmem:[%s1396_s1 + $0x8] sm:$0xff]   ;;  %v1086_v30 = vld [vmem:[%s1396_s1] sm:$0xff]   ;;  %v1094_v40 = vld [vmem:[%s1396_s1 + $0x1f8] sm:$0xff]  }
   0xc   :  { %942 = vmatpush3.bf16.msra.mxu0 %v1066_v10  ;;  %v1083_v27 = vld [vmem:[%s1396_s1 + $0x88] sm:$0xff]   ;;  %v1087_v31 = vld [vmem:[%s1396_s1 + $0x80] sm:$0xff]   ;;  %v1095_v41 = vld [vmem:[%s1396_s1 + $0x1b8] sm:$0xff]  }
   0xd   :  { %964 = vmatpush3.bf16.msra.mxu1 %v1067_v11  ;;  %943 = vmatprep.subr.bf16.mxu0 %v1068_v12  ;;  %v21_v32 = vld [vmem:[%s1397_s0] sm:$0xff]  ;;  %v22_v33 = vld [vmem:[%s1397_s0 + $0x8] sm:$0xff]  ;;  %v1096_v42 = vld [vmem:[%s1396_s1 + $0x170] sm:$0xff]  }
   0xe   :  { %965 = vmatprep.subr.bf16.mxu1 %v1069_v13  ;;  %v855_v34 = vcombine.low %v21_v32, %v21_v32  ;;  %v856_v35 = vcombine.high %v21_v32, %v21_v32  ;;  %v857_v36 = vcombine.low %v22_v33, %v22_v33  ;;  %v858_v37 = vcombine.high %v22_v33, %v22_v33  ;;  %v1097_v43 = vld [vmem:[%s1396_s1 + $0x130] sm:$0xff]   ;;  %v1100_v46 = vld [vmem:[%s1396_s1 + $0x168] sm:$0xff]   ;;  %v1104_v50 = vld [vmem:[%s1396_s1 + $0x160] sm:$0xff]  }
   0xf   :  { %v1098_v44 = vld [vmem:[%s1396_s1 + $0x1f0] sm:$0xff]   ;;  %v1101_v47 = vld [vmem:[%s1396_s1 + $0x128] sm:$0xff]   ;;  %v1105_v51 = vld [vmem:[%s1396_s1 + $0x120] sm:$0xff]   ;;  %v1137_v13 = vmov 0.0  }
  0x10   :  { %944 = vmatpush3.bf16.msra.mxu0 %v1070_v14  ;;  %666 = vmatprep.mubr.bf16.mxu0 %v856_v35  ;;  %v1099_v45 = vld [vmem:[%s1396_s1 + $0x1b0] sm:$0xff]   ;;  %v1102_v48 = vld [vmem:[%s1396_s1 + $0x1e8] sm:$0xff]   ;;  %v1106_v52 = vld [vmem:[%s1396_s1 + $0x1e0] sm:$0xff]  }
  0x11   :  { %966 = vmatpush3.bf16.msra.mxu1 %v1071_v15  ;;  %945 = vmatprep.subr.bf16.mxu0 %v1072_v16  ;;  %v1103_v49 = vld [vmem:[%s1396_s1 + $0x1a8] sm:$0xff]   ;;  %v1107_v53 = vld [vmem:[%s1396_s1 + $0x1a0] sm:$0xff]   ;;  %v1108_v54 = vld [vmem:[%s1396_s1 + $0x158] sm:$0xff]  }
  0x12   :  { %967 = vmatprep.subr.bf16.mxu1 %v1073_v17  ;;  %706 = vmatprep.mubr.bf16.mxu1 %v858_v37  ;;  %v1109_v55 = vld [vmem:[%s1396_s1 + $0x118] sm:$0xff]   ;;  %v1112_v58 = vld [vmem:[%s1396_s1 + $0x150] sm:$0xff]   ;;  %v1116_v62 = vld [vmem:[%s1396_s1 + $0x148] sm:$0xff]  }
  0x13   :  { %v1110_v56 = vld [vmem:[%s1396_s1 + $0x1d8] sm:$0xff]   ;;  %v1113_v59 = vld [vmem:[%s1396_s1 + $0x110] sm:$0xff]   ;;  %v1117_v63 = vld [vmem:[%s1396_s1 + $0x108] sm:$0xff]  }
  0x14   :  { %946 = vmatpush3.bf16.msra.mxu0 %v1074_v18  ;;  %v1111_v57 = vld [vmem:[%s1396_s1 + $0x198] sm:$0xff]   ;;  %v1114_v60 = vld [vmem:[%s1396_s1 + $0x1d0] sm:$0xff]   ;;  %v1118_v0 = vld [vmem:[%s1396_s1 + $0x1c8] sm:$0xff]  }
  0x15   :  { %968 = vmatpush3.bf16.msra.mxu1 %v1075_v19  ;;  %947 = vmatprep.subr.bf16.mxu0 %v1076_v20  ;;  %v1115_v61 = vld [vmem:[%s1396_s1 + $0x190] sm:$0xff]   ;;  %v1119_v1 = vld [vmem:[%s1396_s1 + $0x188] sm:$0xff]   ;;  %v1120_v2 = vld [vmem:[%s1396_s1 + $0x140] sm:$0xff]  }
  0x16   :  { %969 = vmatprep.subr.bf16.mxu1 %v1077_v21  ;;  %v1121_v3 = vld [vmem:[%s1396_s1 + $0x100] sm:$0xff]   ;;  %v23_v5 = vld [vmem:[%s1397_s0 + $0x10] sm:$0xff]  ;;  %v24_v9 = vld [vmem:[%s1397_s0 + $0x18] sm:$0xff] }
  0x17   :  { %v1122_v4 = vld [vmem:[%s1396_s1 + $0x1c0] sm:$0xff]   ;;  %v860_v6 = vcombine.high %v23_v5, %v23_v5  ;;  %v859_v8 = vcombine.low %v23_v5, %v23_v5  ;;  %v861_v10 = vcombine.low %v24_v9, %v24_v9  ;;  %v862_v11 = vcombine.high %v24_v9, %v24_v9  ;;  %v1128_v12 = vld [vmem:[%s1396_s1 + $0x238] sm:$0xff]   ;;  %v1129_v14 = vld [vmem:[%s1396_s1 + $0x230] sm:$0xff]  }
  0x18   :  { %948 = vmatpush3.bf16.msra.mxu0 %v1078_v22  ;;  %v1125_v7 = vld [vmem:[%s1396_s1 + $0x180] sm:$0xff]   ;;  %v1130_v15 = vld [vmem:[%s1396_s1 + $0x228] sm:$0xff]   ;;  %v1132_v17 = vld [vmem:[%s1396_s1 + $0x218] sm:$0xff]  }
  0x19   :  { %970 = vmatpush3.bf16.msra.mxu1 %v1079_v23  ;;  %949 = vmatprep.subr.bf16.mxu0 %v1080_v24  ;;  %v1131_v16 = vld [vmem:[%s1396_s1 + $0x220] sm:$0xff]   ;;  %v1133_v18 = vld [vmem:[%s1396_s1 + $0x210] sm:$0xff]   ;;  %v1134_v19 = vld [vmem:[%s1396_s1 + $0x208] sm:$0xff]  }
  0x1a   :  { %971 = vmatprep.subr.bf16.mxu1 %v1081_v25  ;;  %v1135_v20 = vld [vmem:[%s1396_s1 + $0x200] sm:$0xff]  }
  0x1b   :  { %v1136_v21 = vld [vmem:[%s1397_s0 + $0x20] ss:$0 sps:$4 sm:$0xff]  }
  0x1c   :  { %950 = vmatpush3.bf16.msra.mxu0 %v1082_v26 }
  0x1d   :  { %972 = vmatpush3.bf16.msra.mxu1 %v1083_v27  ;;  %951 = vmatprep.subr.bf16.mxu0 %v1084_v28 }
  0x1e   :  { %973 = vmatprep.subr.bf16.mxu1 %v1085_v29 }
  0x20   :  { %952 = vmatpush3.bf16.msra.mxu0 %v1086_v30 }
  0x21   :  { %974 = vmatpush3.bf16.msra.mxu1 %v1087_v31  ;;  %981 = vmatprep.subr.bf16.mxu0 %v1092_v38 }
  0x22   :  { %1003 = vmatprep.subr.bf16.mxu1 %v1094_v40 }
  0x23   :  { %667 = vmatmul.mubr.bf16.vlgmr.msra.gmra.mxu0 %v855_v34 }
  0x24   :  { %707 = vmatmul.mubr.bf16.vlgmr.msra.gmra.mxu1 %v857_v36  ;;  %982 = vmatpush3.bf16.msra.mxu0 %v1093_v39 }
  0x25   :  { %1004 = vmatpush3.bf16.msra.mxu1 %v1095_v41  ;;  %983 = vmatprep.subr.bf16.mxu0 %v1096_v42 }
  0x26   :  { %1005 = vmatprep.subr.bf16.mxu1 %v1098_v44  ;;  %746 = vmatprep.mubr.bf16.mxu0 %v860_v6 }
  0x27   :  { %786 = vmatprep.mubr.bf16.mxu1 %v862_v11 }
  0x28   :  { %984 = vmatpush3.bf16.msra.mxu0 %v1097_v43 }
  0x29   :  { %1006 = vmatpush3.bf16.msra.mxu1 %v1099_v45  ;;  %985 = vmatprep.subr.bf16.mxu0 %v1100_v46  ;;  %v936_v46 = vld [vmem:[%s1398_s2] ss:$0 sm:$0xff] }
  0x2a   :  { %1007 = vmatprep.subr.bf16.mxu1 %v1102_v48 }
  0x2c   :  { %986 = vmatpush3.bf16.msra.mxu0 %v1101_v47 }
  0x2d   :  { %1008 = vmatpush3.bf16.msra.mxu1 %v1103_v49  ;;  %987 = vmatprep.subr.bf16.mxu0 %v1104_v50 }
  0x2e   :  { %1009 = vmatprep.subr.bf16.mxu1 %v1106_v52 }
  0x30   :  { %988 = vmatpush3.bf16.msra.mxu0 %v1105_v51 }
  0x31   :  { %1010 = vmatpush3.bf16.msra.mxu1 %v1107_v53  ;;  %989 = vmatprep.subr.bf16.mxu0 %v1108_v54 }
  0x32   :  { %1011 = vmatprep.subr.bf16.mxu1 %v1110_v56 }
  0x34   :  { %990 = vmatpush3.bf16.msra.mxu0 %v1109_v55 }
  0x35   :  { %1012 = vmatpush3.bf16.msra.mxu1 %v1111_v57  ;;  %991 = vmatprep.subr.bf16.mxu0 %v1112_v58 }
  0x36   :  { %1013 = vmatprep.subr.bf16.mxu1 %v1114_v60 }
  0x38   :  { %992 = vmatpush3.bf16.msra.mxu0 %v1113_v59 }
  0x39   :  { %1014 = vmatpush3.bf16.msra.mxu1 %v1115_v61  ;;  %993 = vmatprep.subr.bf16.mxu0 %v1116_v62 }
  0x3a   :  { %1015 = vmatprep.subr.bf16.mxu1 %v1118_v0 }
  0x3c   :  { %994 = vmatpush3.bf16.msra.mxu0 %v1117_v63 }
  0x3d   :  { %1016 = vmatpush3.bf16.msra.mxu1 %v1119_v1  ;;  %995 = vmatprep.subr.bf16.mxu0 %v1120_v2 }
  0x3e   :  { %1017 = vmatprep.subr.bf16.mxu1 %v1122_v4 }
  0x40   :  { %996 = vmatpush3.bf16.msra.mxu0 %v1121_v3 }
  0x41   :  { %1018 = vmatpush3.bf16.msra.mxu1 %v1125_v7  ;;  %1034 = vmatprep.subr.bf16.mxu0 %v1137_v13 }
  0x43   :  { %747 = vmatmul.mubr.bf16.vlgmr.msra.gmra.mxu0 %v859_v8 }
  0x44   :  { %1035 = vmatpush3.bf16.msra.mxu0 %v1128_v12  ;;  %787 = vmatmul.mubr.bf16.vlgmr.msra.gmra.mxu1 %v861_v10 }
  0x45   :  { %1036 = vmatprep.subr.bf16.mxu0 %v1137_v13  ;;  %1050 = vmatprep.mubr.msk.bf16.mxu0 %vm1138_vm0, %v1137_v13 }
  0x48   :  { %1037 = vmatpush3.bf16.msra.mxu0 %v1129_v14 }
  0x49   :  { %1038 = vmatprep.subr.bf16.mxu0 %v1137_v13 }
  0x4c   :  { %1039 = vmatpush3.bf16.msra.mxu0 %v1130_v15 }
  0x4d   :  { %1040 = vmatprep.subr.bf16.mxu0 %v1137_v13 }
  0x50   :  { %1041 = vmatpush3.bf16.msra.mxu0 %v1131_v16 }
  0x51   :  { %1042 = vmatprep.subr.bf16.mxu0 %v1137_v13 }
  0x54   :  { %1043 = vmatpush3.bf16.msra.mxu0 %v1132_v17 }
  0x55   :  { %1044 = vmatprep.subr.bf16.mxu0 %v1137_v13 }
  0x58   :  { %1045 = vmatpush3.bf16.msra.mxu0 %v1133_v18 }
  0x59   :  { %1046 = vmatprep.subr.bf16.mxu0 %v1137_v13 }
  0x5c   :  { %1047 = vmatpush3.bf16.msra.mxu0 %v1134_v19 }
  0x5d   :  { %1048 = vmatprep.subr.bf16.mxu0 %v1137_v13 }
  0x60   :  { %1049 = vmatpush3.bf16.msra.mxu0 %v1135_v20 }
  0x63   :  { %1051 = vmatmul.mubr.bf16.vlgmr.msra.gmra.mxu0 %v1136_v21 }
  0xe3   :  { %v953_v22 = vpop.f32.mrf.mxu0 }
  0xe4   :  { %v975_v23 = vpop.f32.mrf.mxu1 }
  0xe5   :  { %v954_v24 = vpop.f32.mrf.mxu0 }
  0xe6   :  { %v976_v25 = vpop.f32.mrf.mxu1  ;;  %v955_v38 = vadd.f32 %v954_v24, %v953_v22 }
  0xe7   :  { %v956_v26 = vpop.f32.mrf.mxu0  ;;  %v977_v39 = vadd.f32 %v976_v25, %v975_v23 }
  0xe8   :  { %v978_v27 = vpop.f32.mrf.mxu1 }
  0xe9   :  { %v957_v28 = vpop.f32.mrf.mxu0  ;;  %v709_v41 = vadd.f32 %v977_v39, %v955_v38 }
  0xea   :  { %v979_v29 = vpop.f32.mrf.mxu1 }
 0x103   :  { %v997_v30 = vpop.f32.mrf.mxu0 }
 0x104   :  { %v1019_v31 = vpop.f32.mrf.mxu1 }
 0x105   :  { %v998_v32 = vpop.f32.mrf.mxu0 }
 0x106   :  { %v1020_v33 = vpop.f32.mrf.mxu1  ;;  %v999_v40 = vadd.f32 %v998_v32, %v997_v30 }
 0x107   :  { %v1000_v34 = vpop.f32.mrf.mxu0  ;;  %v1021_v43 = vadd.f32 %v1020_v33, %v1019_v31 }
 0x108   :  { %v1022_v35 = vpop.f32.mrf.mxu1  ;;  %v749_v42 = vadd.f32 %v999_v40, %v709_v41 }
 0x109   :  { %v1001_v36 = vpop.f32.mrf.mxu0 }
 0x10a   :  { %v1023_v37 = vpop.f32.mrf.mxu1  ;;  %v789_v44 = vadd.f32 %v1021_v43, %v749_v42 }
 0x123   :  { %v828_v45 = vpop.f32.mrf.mxu0 }
 0x124   :  { %v829_v47 = vadd.f32 %v828_v45, %v789_v44 }
 0x125   :  { %v1052_v48 = vpop.f32.mrf.mxu0 }
 0x126   :  { %v847_v49 = vadd.f32 %v936_v46, %v829_v47 }
 0x127   :  { %v831_v50 = vpop.f32.mrf.mxu0 }
 0x128   :  { %v848_v51 = vmax.f32 %v847_v49, 0.0 }
 0x129   :  { %v1053_v52 = vpop.f32.mrf.mxu0 }
 0x12a   :  { %v849_v53 = vpack.c.bf16 %v848_v51, %v848_v51 }
 0x12c   :  { %850 = vst [vmem:[%s1399_s3] sm:$0xf] %v849_v53 }

// kernel: neuralnet_forward.9
= control target key start
LH: loop header
LB: loop body
LE: loop exit
PB: predicated region body
PF: predicated region fallthrough
CT: control target
= control target key end

     0   :  { %vm19_vm0 = vcmask 441344   ;;  %v195_v0 = vmov 0.0   ;;  %vm196_vm1 = vmmov 0   ;;  %s253_s1 = inlined_call_operand.vmem [shape: bf16[128,54], index: 1, kind: input, shape index: {}]   ;;  %s254_s0 = inlined_call_operand.vmem [shape: bf16[8,128], index: 0, kind: input, shape index: {}]   ;;  %s255_s2 = inlined_call_operand.vmem [shape: f32[1,54], index: 2, kind: input, shape index: {}]   ;;  %s256_s3 = inlined_call_operand.vmem [shape: f32[8,54], index: 3, kind: output, shape index: {}]  }
   0x1   :  { %165 = vmatprep.subr.bf16.mxu0 %v195_v0  ;;  %v187_v1 = vld [vmem:[%s253_s1 + $0x38] sm:$0xff]   ;;  %181 = vmatprep.mubr.msk.bf16.mxu0 %vm196_vm1, %v195_v0  ;;  %20 = vst.msk [vmem:[#allocation2] sm:$0xff] %vm19_vm0, %v195_v0  ;;  %v188_v2 = vld [vmem:[%s253_s1 + $0x30] sm:$0xff]   ;;  %v189_v3 = vld [vmem:[%s253_s1 + $0x28] sm:$0xff]  }
   0x2   :  { %166 = vmatpush3.bf16.msra.mxu0 %v187_v1  ;;  %v190_v4 = vld [vmem:[%s253_s1 + $0x20] sm:$0xff]   ;;  %v191_v5 = vld [vmem:[%s253_s1 + $0x18] sm:$0xff]   ;;  %v192_v6 = vld [vmem:[%s253_s1 + $0x10] sm:$0xff]  }
   0x3   :  { %167 = vmatprep.subr.bf16.mxu0 %v195_v0  ;;  %v193_v7 = vld [vmem:[%s253_s1 + $0x8] sm:$0xff]   ;;  %v194_v8 = vld [vmem:[%s253_s1] sm:$0xff]  }
   0x4   :  { %v22_v9 = vld [vmem:[%s254_s0] sm:$0xf] }
   0x5   :  { %v155_v16 = vld [vmem:[%s255_s2] ss:$0 sm:$0xff] }
   0x6   :  { %168 = vmatpush3.bf16.msra.mxu0 %v188_v2 }
   0x7   :  { %169 = vmatprep.subr.bf16.mxu0 %v195_v0 }
   0x8   :  { %v21_v10 = vld [vmem:[#allocation2] sm:$0xff] }
   0xa   :  { %170 = vmatpush3.bf16.msra.mxu0 %v189_v3 }
   0xb   :  { %171 = vmatprep.subr.bf16.mxu0 %v195_v0 }
   0xe   :  { %172 = vmatpush3.bf16.msra.mxu0 %v190_v4 }
   0xf   :  { %173 = vmatprep.subr.bf16.mxu0 %v195_v0 }
  0x12   :  { %174 = vmatpush3.bf16.msra.mxu0 %v191_v5 }
  0x13   :  { %175 = vmatprep.subr.bf16.mxu0 %v195_v0 }
  0x16   :  { %176 = vmatpush3.bf16.msra.mxu0 %v192_v6 }
  0x17   :  { %177 = vmatprep.subr.bf16.mxu0 %v195_v0 }
  0x1a   :  { %178 = vmatpush3.bf16.msra.mxu0 %v193_v7 }
  0x1b   :  { %179 = vmatprep.subr.bf16.mxu0 %v195_v0 }
  0x1e   :  { %180 = vmatpush3.bf16.msra.mxu0 %v194_v8 }
  0x21   :  { %182 = vmatmul.mubr.bf16.vlgmr.msra.gmra.mxu0 %v22_v9 }
  0xe1   :  { %v121_v11 = vpop.f32.mrf.mxu0 }
  0xe2   :  { %v127_v12 = vadd.f32 %v121_v11, %v21_v10 }
  0xe3   :  { %v183_v13 = vpop.f32.mrf.mxu0 }
  0xe4   :  { %129 = vst.msk [vmem:[#allocation2] sm:$0xff] %vm19_vm0, %v127_v12 }
  0xe5   :  { %v124_v14 = vpop.f32.mrf.mxu0 }
  0xe7   :  { %v184_v15 = vpop.f32.mrf.mxu0 }
  0xeb   :  { %v133_v17 = vld [vmem:[#allocation2] sm:$0xff] }
  0xec   :  { %v141_v18 = vadd.f32 %v155_v16, %v133_v17 }
  0xee   :  { %142 = vst.msk [vmem:[%s256_s3] sm:$0xff] %vm19_vm0, %v141_v18 }

</bundles_post_ra>
